<compile_context>
chip_gen: v7x
topology: tpu7x:2x2x1
jax: 0.10.0
libtpu: 0.0.40
codegen_flags: <defaults>
</compile_context>

<pallas_src>
import jax
import jax.numpy as jnp
from jax.experimental import pallas as pl
from jax.experimental.pallas import tpu as pltpu


def _round_up(x, m):
    return (x + m - 1) // m * m


def gru_seq_kernel(gx_ref, len_ref, whh_ref, bhn_ref, out_ref, hid_ref):
    """Whole GRU recurrence in a single kernel invocation.

    gx_ref : (T, 3, B, H)  precomputed input projections per gate (r, z, n); b_ih (+ b_hh for
                           the r/z gates) already folded in.
    len_ref: (B, 1) int32  sequence lengths (padded batch rows have length 0).
    whh_ref: (3, H, H)     W_hh^T per gate, so gh_g = h @ whh_ref[g].
    bhn_ref: (1, H)        hidden bias of the n gate (only bias needed inside the loop).
    out_ref: (B, T, H)     per-step outputs, batch-major, exactly zero past each length.
    hid_ref: (1, B, H)     final hidden state (h frozen at each sequence's last valid step).
    """
    T = gx_ref.shape[0]
    B = out_ref.shape[0]
    H = out_ref.shape[2]

    lens = len_ref[...]                                    # hoisted: one VMEM load total
    b_n = jnp.broadcast_to(bhn_ref[...], (B, H))           # hoisted broadcast (no per-step bcast)

    h = jnp.zeros((B, H), jnp.float32)                     # hidden carried in vregs
    # Statically unrolled time loop (T small & known at trace time); every Ref index is static,
    # so all loads/stores are plain aligned lane-dense VMEM accesses.
    # TODO(synk): for long sequences switch to lax.fori_loop(unroll=...) with dynamic gx_ref[t].
    for t in range(T):
        gx = gx_ref[t]                                     # (3, B, H)
        gh_r = jnp.dot(h, whh_ref[0], preferred_element_type=jnp.float32)
        gh_z = jnp.dot(h, whh_ref[1], preferred_element_type=jnp.float32)
        gh_n = jnp.dot(h, whh_ref[2], preferred_element_type=jnp.float32) + b_n

        r = jax.nn.sigmoid(gx[0] + gh_r)
        z = jax.nn.sigmoid(gx[1] + gh_z)
        n = jnp.tanh(gx[2] + r * gh_n)
        h_new = (1.0 - z) * n + z * h

        mask = t < lens                                    # (B, 1) bool
        h = jnp.where(mask, h_new, h)                      # freeze h past length (pack semantics)
        out_ref[:, t, :] = jnp.where(mask, h_new, 0.0)     # padded positions are exactly zero

    hid_ref[0] = h                                         # written once, after the loop


def encoder_forward(params, tokens, lengths, t_max=None):
    """Mirrors Encoder.forward: returns (outputs (B, t_max, H), hidden (1, B, H))."""
    emb_tbl = params["emb"]
    w_ih, w_hh = params["w_ih"], params["w_hh"]            # (3H, E), (3H, H)
    b_ih, b_hh = params["b_ih"], params["b_hh"]            # (3H,), (3H,)

    B, T = tokens.shape
    E = emb_tbl.shape[1]
    H = w_hh.shape[1]
    B_pad = _round_up(B, 8)                                # full sublanes
    H_pad = _round_up(H, 128)                              # lane-dense stores / tile-aligned gates

    # ---- pad batch (padded rows: token 0 == padding_idx, length 0 -> stay all-zero) ----
    tokens_p = jnp.pad(tokens, ((0, B_pad - B), (0, 0)))
    lens_p = jnp.pad(lengths.astype(jnp.int32), (0, B_pad - B)).reshape(B_pad, 1)

    # ---- gate-separated, H-padded weights (PyTorch gate order r, z, n) ----
    w_ih_g = jnp.transpose(
        jnp.pad(w_ih.reshape(3, H, E), ((0, 0), (0, H_pad - H), (0, 0))), (0, 2, 1))   # (3,E,Hp)
    w_hh_t = jnp.transpose(
        jnp.pad(w_hh.reshape(3, H, H), ((0, 0), (0, H_pad - H), (0, H_pad - H))),
        (0, 2, 1))                                                                     # (3,Hp,Hp)
    b_ih_g = jnp.pad(b_ih.reshape(3, H), ((0, 0), (0, H_pad - H)))
    b_hh_g = jnp.pad(b_hh.reshape(3, H), ((0, 0), (0, H_pad - H)))
    gx_bias = b_ih_g.at[0].add(b_hh_g[0]).at[1].add(b_hh_g[1])   # fold b_hh of r,z into gx bias
    b_hn = b_hh_g[2].reshape(1, H_pad)                           # only bias left in the loop

    # ---- embedding lookup + hoisted input projection: one batched MXU matmul over all T,
    #      bf16 operands / f32 accumulation, produced directly in gate-separated layout ----
    embedded = jnp.take(emb_tbl, tokens_p, axis=0)               # (B_pad, T, E)
    gx = jnp.einsum(
        "bte,geh->tgbh",
        embedded.astype(jnp.bfloat16), w_ih_g.astype(jnp.bfloat16),
        preferred_element_type=jnp.float32)                      # (T, 3, B_pad, H_pad) f32
    gx = gx + gx_bias[None, :, None, :]

    out_full, hid_full = pl.pallas_call(
        gru_seq_kernel,
        out_shape=(
            jax.ShapeDtypeStruct((B_pad, T, H_pad), jnp.float32),   # batch-major outputs
            jax.ShapeDtypeStruct((1, B_pad, H_pad), jnp.float32),   # final hidden
        ),
        in_specs=[pl.BlockSpec(memory_space=pltpu.MemorySpace.VMEM)] * 4,
        out_specs=(pl.BlockSpec(memory_space=pltpu.MemorySpace.VMEM),
                   pl.BlockSpec(memory_space=pltpu.MemorySpace.VMEM)),
    )(gx, lens_p, w_hh_t, b_hn)

    if t_max is None:
        t_max = T                                                # static; no device->host sync
    outputs = out_full[:B, :t_max, :H]
    hidden = hid_full[:, :B, :H]
    return outputs, hidden


def make_params(key, input_size, embed_size, hidden_size):
    k_emb, k_wih, k_whh, k_bih, k_bhh = jax.random.split(key, 5)
    scale_e = 1.0 / jnp.sqrt(embed_size)
    scale_h = 1.0 / jnp.sqrt(hidden_size)

    emb = jax.random.normal(k_emb, (input_size, embed_size), jnp.float32) * scale_e
    emb = emb.at[0].set(0.0)                      # padding_idx=0 -> zero row

    w_ih = jax.random.uniform(k_wih, (3 * hidden_size, embed_size), jnp.float32,
                              -scale_h, scale_h)
    w_hh = jax.random.uniform(k_whh, (3 * hidden_size, hidden_size), jnp.float32,
                              -scale_h, scale_h)
    b_ih = jax.random.uniform(k_bih, (3 * hidden_size,), jnp.float32, -scale_h, scale_h)
    b_hh = jax.random.uniform(k_bhh, (3 * hidden_size,), jnp.float32, -scale_h, scale_h)
    return dict(emb=emb, w_ih=w_ih, w_hh=w_hh, b_ih=b_ih, b_hh=b_hh)


def reference_encoder(params, tokens, lengths):
    """Pure-JAX (non-Pallas) f32 reference mirroring PyTorch pack/pad GRU semantics."""
    emb = jnp.take(params["emb"], tokens, axis=0)                # (B, T, E)
    w_ih, w_hh = params["w_ih"], params["w_hh"]
    b_ih, b_hh = params["b_ih"], params["b_hh"]
    B, T = tokens.shape
    H = w_hh.shape[1]

    def cell(h, inp):
        x_t, m_t = inp                                           # (B,E), (B,1)
        gx = x_t @ w_ih.T + b_ih
        gh = h @ w_hh.T + b_hh
        r = jax.nn.sigmoid(gx[:, :H] + gh[:, :H])
        z = jax.nn.sigmoid(gx[:, H:2 * H] + gh[:, H:2 * H])
        n = jnp.tanh(gx[:, 2 * H:] + r * gh[:, 2 * H:])
        h_new = (1.0 - z) * n + z * h
        h_next = jnp.where(m_t, h_new, h)
        return h_next, jnp.where(m_t, h_new, 0.0)

    mask = jnp.arange(T)[None, :] < lengths[:, None]             # (B, T)
    xs = (jnp.transpose(emb, (1, 0, 2)), jnp.transpose(mask)[:, :, None])
    h0 = jnp.zeros((B, H), jnp.float32)
    hN, outs = jax.lax.scan(cell, h0, xs)
    return jnp.transpose(outs, (1, 0, 2)), hN[None]


if __name__ == "__main__":
    input_size = 16     # vocab
    embed_size = 32
    hidden_size = 32
    B, T = 2, 8

    key = jax.random.PRNGKey(0)
    k_params, k_tok = jax.random.split(key)
    params = make_params(k_params, input_size, embed_size, hidden_size)

    lengths_list = [8, 5]
    lengths = jnp.array(lengths_list, dtype=jnp.int32)
    tokens = jax.random.randint(k_tok, (B, T), 1, input_size, dtype=jnp.int32)
    pos = jnp.arange(T)[None, :]
    tokens = jnp.where(pos < lengths[:, None], tokens, 0)   # padding_idx=0 past each length

    t_max = max(lengths_list)   # static Python int (pad_packed_sequence trim) -> no device sync

    fwd = jax.jit(encoder_forward, static_argnames=("t_max",))
    outputs, hidden = fwd(params, tokens, lengths, t_max=t_max)
    jax.block_until_ready((outputs, hidden))

    # Shape / pack-pad semantics checks.
    assert outputs.shape == (B, t_max, hidden_size)
    assert hidden.shape == (1, B, hidden_size)
    assert float(jnp.abs(outputs[1, lengths_list[1]:, :]).max()) == 0.0   # padded outputs == 0

    # Numerical check vs. a pure-JAX f32 reference (loose atol: bf16 MXU input projection).
    ref_out, ref_hid = reference_encoder(params, tokens, lengths)
    assert jnp.allclose(outputs, ref_out[:, :t_max, :], atol=2e-2), "outputs mismatch"
    assert jnp.allclose(hidden, ref_hid, atol=2e-2), "hidden mismatch"

    print("KERNEL_OK")
</pallas_src>

<mosaic_0001>
module attributes {stable_mosaic.version = 11 : i64} {
  func.func @gru_seq_kernel(%arg0: memref<8x3x8x128xf32, #tpu.memory_space<vmem>>, %arg1: memref<8x1xi32, #tpu.memory_space<vmem>>, %arg2: memref<3x128x128xf32, #tpu.memory_space<vmem>>, %arg3: memref<1x128xf32, #tpu.memory_space<vmem>>, %arg4: memref<8x8x128xf32, #tpu.memory_space<vmem>>, %arg5: memref<1x8x128xf32, #tpu.memory_space<vmem>>) attributes {dimension_semantics = [], scalar_prefetch = 0 : i64, scratch_operands = 0 : i64, tpu.core_type = #tpu.core_type<tc>} {
    %c0 = arith.constant 0 : index
    %c0_0 = arith.constant 0 : index
    %0 = vector.load %arg1[%c0, %c0_0] : memref<8x1xi32, #tpu.memory_space<vmem>>, vector<8x1xi32>
    %c0_1 = arith.constant 0 : index
    %c0_2 = arith.constant 0 : index
    %1 = vector.load %arg3[%c0_1, %c0_2] : memref<1x128xf32, #tpu.memory_space<vmem>>, vector<1x128xf32>
    %2 = vector.shape_cast %1 : vector<1x128xf32> to vector<1x128xf32>
    %3 = vector.broadcast %2 : vector<1x128xf32> to vector<8x128xf32>
    %cst = arith.constant 0.000000e+00 : f32
    %4 = vector.broadcast %cst : f32 to vector<8x128xf32>
    %c0_3 = arith.constant 0 : index
    %c0_4 = arith.constant 0 : index
    %c0_5 = arith.constant 0 : index
    %c0_6 = arith.constant 0 : index
    %5 = vector.load %arg0[%c0_3, %c0_4, %c0_5, %c0_6] : memref<8x3x8x128xf32, #tpu.memory_space<vmem>>, vector<1x3x8x128xf32>
    %6 = vector.shape_cast %5 : vector<1x3x8x128xf32> to vector<3x8x128xf32>
    %c0_7 = arith.constant 0 : index
    %c0_8 = arith.constant 0 : index
    %c0_9 = arith.constant 0 : index
    %7 = vector.load %arg2[%c0_7, %c0_8, %c0_9] : memref<3x128x128xf32, #tpu.memory_space<vmem>>, vector<1x128x128xf32>
    %8 = vector.shape_cast %7 : vector<1x128x128xf32> to vector<128x128xf32>
    %cst_10 = arith.constant dense<0.000000e+00> : vector<8x128xf32>
    %9 = tpu.matmul %4, %8, %cst_10 {dimension_numbers = #tpu.dot_dimension_numbers<[1], [0], [0], [1], [0, 0, 1, 1], [], []>} : vector<8x128xf32>, vector<128x128xf32>, vector<8x128xf32> -> vector<8x128xf32>
    %c1 = arith.constant 1 : index
    %c0_11 = arith.constant 0 : index
    %c0_12 = arith.constant 0 : index
    %10 = vector.load %arg2[%c1, %c0_11, %c0_12] : memref<3x128x128xf32, #tpu.memory_space<vmem>>, vector<1x128x128xf32>
    %11 = vector.shape_cast %10 : vector<1x128x128xf32> to vector<128x128xf32>
    %cst_13 = arith.constant dense<0.000000e+00> : vector<8x128xf32>
    %12 = tpu.matmul %4, %11, %cst_13 {dimension_numbers = #tpu.dot_dimension_numbers<[1], [0], [0], [1], [0, 0, 1, 1], [], []>} : vector<8x128xf32>, vector<128x128xf32>, vector<8x128xf32> -> vector<8x128xf32>
    %c2 = arith.constant 2 : index
    %c0_14 = arith.constant 0 : index
    %c0_15 = arith.constant 0 : index
    %13 = vector.load %arg2[%c2, %c0_14, %c0_15] : memref<3x128x128xf32, #tpu.memory_space<vmem>>, vector<1x128x128xf32>
    %14 = vector.shape_cast %13 : vector<1x128x128xf32> to vector<128x128xf32>
    %cst_16 = arith.constant dense<0.000000e+00> : vector<8x128xf32>
    %15 = tpu.matmul %4, %14, %cst_16 {dimension_numbers = #tpu.dot_dimension_numbers<[1], [0], [0], [1], [0, 0, 1, 1], [], []>} : vector<8x128xf32>, vector<128x128xf32>, vector<8x128xf32> -> vector<8x128xf32>
    %16 = arith.addf %15, %3 : vector<8x128xf32>
    %17 = vector.extract_strided_slice %6 {offsets = [0, 0, 0], sizes = [1, 8, 128], strides = [1, 1, 1]} : vector<3x8x128xf32> to vector<1x8x128xf32>
    %18 = vector.shape_cast %17 : vector<1x8x128xf32> to vector<8x128xf32>
    %19 = arith.addf %18, %9 : vector<8x128xf32>
    %20 = arith.negf %19 : vector<8x128xf32>
    %21 = math.exp %20 : vector<8x128xf32>
    %cst_17 = arith.constant 1.000000e+00 : f32
    %22 = vector.broadcast %cst_17 : f32 to vector<8x128xf32>
    %23 = arith.addf %22, %21 : vector<8x128xf32>
    %24 = arith.divf %22, %23 : vector<8x128xf32>
    %25 = vector.extract_strided_slice %6 {offsets = [1, 0, 0], sizes = [1, 8, 128], strides = [1, 1, 1]} : vector<3x8x128xf32> to vector<1x8x128xf32>
    %26 = vector.shape_cast %25 : vector<1x8x128xf32> to vector<8x128xf32>
    %27 = arith.addf %26, %12 : vector<8x128xf32>
    %28 = arith.negf %27 : vector<8x128xf32>
    %29 = math.exp %28 : vector<8x128xf32>
    %cst_18 = arith.constant 1.000000e+00 : f32
    %30 = vector.broadcast %cst_18 : f32 to vector<8x128xf32>
    %31 = arith.addf %30, %29 : vector<8x128xf32>
    %32 = arith.divf %30, %31 : vector<8x128xf32>
    %33 = vector.extract_strided_slice %6 {offsets = [2, 0, 0], sizes = [1, 8, 128], strides = [1, 1, 1]} : vector<3x8x128xf32> to vector<1x8x128xf32>
    %34 = vector.shape_cast %33 : vector<1x8x128xf32> to vector<8x128xf32>
    %35 = arith.mulf %24, %16 : vector<8x128xf32>
    %36 = arith.addf %34, %35 : vector<8x128xf32>
    %37 = math.tanh %36 : vector<8x128xf32>
    %cst_19 = arith.constant 1.000000e+00 : f32
    %38 = vector.broadcast %cst_19 : f32 to vector<8x128xf32>
    %39 = arith.subf %38, %32 : vector<8x128xf32>
    %40 = arith.mulf %39, %37 : vector<8x128xf32>
    %41 = arith.mulf %32, %4 : vector<8x128xf32>
    %42 = arith.addf %40, %41 : vector<8x128xf32>
    %c0_i32 = arith.constant 0 : i32
    %43 = vector.broadcast %c0_i32 : i32 to vector<8x1xi32>
    %44 = arith.cmpi sgt, %0, %43 : vector<8x1xi32>
    %45 = vector.shape_cast %44 : vector<8x1xi1> to vector<8x1xi1>
    %46 = vector.broadcast %45 : vector<8x1xi1> to vector<8x128xi1>
    %47 = arith.select %46, %42, %4 : vector<8x128xi1>, vector<8x128xf32>
    %cst_20 = arith.constant 0.000000e+00 : f32
    %48 = vector.shape_cast %44 : vector<8x1xi1> to vector<8x1xi1>
    %49 = vector.broadcast %48 : vector<8x1xi1> to vector<8x128xi1>
    %50 = vector.broadcast %cst_20 : f32 to vector<8x128xf32>
    %51 = arith.select %49, %42, %50 : vector<8x128xi1>, vector<8x128xf32>
    %c0_21 = arith.constant 0 : index
    %c0_22 = arith.constant 0 : index
    %c0_23 = arith.constant 0 : index
    %52 = vector.load %arg4[%c0_21, %c0_22, %c0_23] : memref<8x8x128xf32, #tpu.memory_space<vmem>>, vector<8x1x128xf32>
    %53 = vector.shape_cast %52 : vector<8x1x128xf32> to vector<8x128xf32>
    %54 = vector.shape_cast %51 : vector<8x128xf32> to vector<8x1x128xf32>
    tpu.vector_store %arg4[%c0_21, %c0_22, %c0_23], %54 {strides = array<i32>} : memref<8x8x128xf32, #tpu.memory_space<vmem>>, vector<8x1x128xf32>,
    %c1_24 = arith.constant 1 : index
    %c0_25 = arith.constant 0 : index
    %c0_26 = arith.constant 0 : index
    %c0_27 = arith.constant 0 : index
    %55 = vector.load %arg0[%c1_24, %c0_25, %c0_26, %c0_27] : memref<8x3x8x128xf32, #tpu.memory_space<vmem>>, vector<1x3x8x128xf32>
    %56 = vector.shape_cast %55 : vector<1x3x8x128xf32> to vector<3x8x128xf32>
    %c0_28 = arith.constant 0 : index
    %c0_29 = arith.constant 0 : index
    %c0_30 = arith.constant 0 : index
    %57 = vector.load %arg2[%c0_28, %c0_29, %c0_30] : memref<3x128x128xf32, #tpu.memory_space<vmem>>, vector<1x128x128xf32>
    %58 = vector.shape_cast %57 : vector<1x128x128xf32> to vector<128x128xf32>
    %cst_31 = arith.constant dense<0.000000e+00> : vector<8x128xf32>
    %59 = tpu.matmul %47, %58, %cst_31 {dimension_numbers = #tpu.dot_dimension_numbers<[1], [0], [0], [1], [0, 0, 1, 1], [], []>} : vector<8x128xf32>, vector<128x128xf32>, vector<8x128xf32> -> vector<8x128xf32>
    %c1_32 = arith.constant 1 : index
    %c0_33 = arith.constant 0 : index
    %c0_34 = arith.constant 0 : index
    %60 = vector.load %arg2[%c1_32, %c0_33, %c0_34] : memref<3x128x128xf32, #tpu.memory_space<vmem>>, vector<1x128x128xf32>
    %61 = vector.shape_cast %60 : vector<1x128x128xf32> to vector<128x128xf32>
    %cst_35 = arith.constant dense<0.000000e+00> : vector<8x128xf32>
    %62 = tpu.matmul %47, %61, %cst_35 {dimension_numbers = #tpu.dot_dimension_numbers<[1], [0], [0], [1], [0, 0, 1, 1], [], []>} : vector<8x128xf32>, vector<128x128xf32>, vector<8x128xf32> -> vector<8x128xf32>
    %c2_36 = arith.constant 2 : index
    %c0_37 = arith.constant 0 : index
    %c0_38 = arith.constant 0 : index
    %63 = vector.load %arg2[%c2_36, %c0_37, %c0_38] : memref<3x128x128xf32, #tpu.memory_space<vmem>>, vector<1x128x128xf32>
    %64 = vector.shape_cast %63 : vector<1x128x128xf32> to vector<128x128xf32>
    %cst_39 = arith.constant dense<0.000000e+00> : vector<8x128xf32>
    %65 = tpu.matmul %47, %64, %cst_39 {dimension_numbers = #tpu.dot_dimension_numbers<[1], [0], [0], [1], [0, 0, 1, 1], [], []>} : vector<8x128xf32>, vector<128x128xf32>, vector<8x128xf32> -> vector<8x128xf32>
    %66 = arith.addf %65, %3 : vector<8x128xf32>
    %67 = vector.extract_strided_slice %56 {offsets = [0, 0, 0], sizes = [1, 8, 128], strides = [1, 1, 1]} : vector<3x8x128xf32> to vector<1x8x128xf32>
    %68 = vector.shape_cast %67 : vector<1x8x128xf32> to vector<8x128xf32>
    %69 = arith.addf %68, %59 : vector<8x128xf32>
    %70 = arith.negf %69 : vector<8x128xf32>
    %71 = math.exp %70 : vector<8x128xf32>
    %cst_40 = arith.constant 1.000000e+00 : f32
    %72 = vector.broadcast %cst_40 : f32 to vector<8x128xf32>
    %73 = arith.addf %72, %71 : vector<8x128xf32>
    %74 = arith.divf %72, %73 : vector<8x128xf32>
    %75 = vector.extract_strided_slice %56 {offsets = [1, 0, 0], sizes = [1, 8, 128], strides = [1, 1, 1]} : vector<3x8x128xf32> to vector<1x8x128xf32>
    %76 = vector.shape_cast %75 : vector<1x8x128xf32> to vector<8x128xf32>
    %77 = arith.addf %76, %62 : vector<8x128xf32>
    %78 = arith.negf %77 : vector<8x128xf32>
    %79 = math.exp %78 : vector<8x128xf32>
    %cst_41 = arith.constant 1.000000e+00 : f32
    %80 = vector.broadcast %cst_41 : f32 to vector<8x128xf32>
    %81 = arith.addf %80, %79 : vector<8x128xf32>
    %82 = arith.divf %80, %81 : vector<8x128xf32>
    %83 = vector.extract_strided_slice %56 {offsets = [2, 0, 0], sizes = [1, 8, 128], strides = [1, 1, 1]} : vector<3x8x128xf32> to vector<1x8x128xf32>
    %84 = vector.shape_cast %83 : vector<1x8x128xf32> to vector<8x128xf32>
    %85 = arith.mulf %74, %66 : vector<8x128xf32>
    %86 = arith.addf %84, %85 : vector<8x128xf32>
    %87 = math.tanh %86 : vector<8x128xf32>
    %cst_42 = arith.constant 1.000000e+00 : f32
    %88 = vector.broadcast %cst_42 : f32 to vector<8x128xf32>
    %89 = arith.subf %88, %82 : vector<8x128xf32>
    %90 = arith.mulf %89, %87 : vector<8x128xf32>
    %91 = arith.mulf %82, %47 : vector<8x128xf32>
    %92 = arith.addf %90, %91 : vector<8x128xf32>
    %c1_i32 = arith.constant 1 : i32
    %93 = vector.broadcast %c1_i32 : i32 to vector<8x1xi32>
    %94 = arith.cmpi sgt, %0, %93 : vector<8x1xi32>
    %95 = vector.shape_cast %94 : vector<8x1xi1> to vector<8x1xi1>
    %96 = vector.broadcast %95 : vector<8x1xi1> to vector<8x128xi1>
    %97 = arith.select %96, %92, %47 : vector<8x128xi1>, vector<8x128xf32>
    %cst_43 = arith.constant 0.000000e+00 : f32
    %98 = vector.shape_cast %94 : vector<8x1xi1> to vector<8x1xi1>
    %99 = vector.broadcast %98 : vector<8x1xi1> to vector<8x128xi1>
    %100 = vector.broadcast %cst_43 : f32 to vector<8x128xf32>
    %101 = arith.select %99, %92, %100 : vector<8x128xi1>, vector<8x128xf32>
    %c0_44 = arith.constant 0 : index
    %c1_45 = arith.constant 1 : index
    %c0_46 = arith.constant 0 : index
    %102 = vector.load %arg4[%c0_44, %c1_45, %c0_46] : memref<8x8x128xf32, #tpu.memory_space<vmem>>, vector<8x1x128xf32>
    %103 = vector.shape_cast %102 : vector<8x1x128xf32> to vector<8x128xf32>
    %104 = vector.shape_cast %101 : vector<8x128xf32> to vector<8x1x128xf32>
    tpu.vector_store %arg4[%c0_44, %c1_45, %c0_46], %104 {strides = array<i32>} : memref<8x8x128xf32, #tpu.memory_space<vmem>>, vector<8x1x128xf32>,
    %c2_47 = arith.constant 2 : index
    %c0_48 = arith.constant 0 : index
    %c0_49 = arith.constant 0 : index
    %c0_50 = arith.constant 0 : index
    %105 = vector.load %arg0[%c2_47, %c0_48, %c0_49, %c0_50] : memref<8x3x8x128xf32, #tpu.memory_space<vmem>>, vector<1x3x8x128xf32>
    %106 = vector.shape_cast %105 : vector<1x3x8x128xf32> to vector<3x8x128xf32>
    %c0_51 = arith.constant 0 : index
    %c0_52 = arith.constant 0 : index
    %c0_53 = arith.constant 0 : index
    %107 = vector.load %arg2[%c0_51, %c0_52, %c0_53] : memref<3x128x128xf32, #tpu.memory_space<vmem>>, vector<1x128x128xf32>
    %108 = vector.shape_cast %107 : vector<1x128x128xf32> to vector<128x128xf32>
    %cst_54 = arith.constant dense<0.000000e+00> : vector<8x128xf32>
    %109 = tpu.matmul %97, %108, %cst_54 {dimension_numbers = #tpu.dot_dimension_numbers<[1], [0], [0], [1], [0, 0, 1, 1], [], []>} : vector<8x128xf32>, vector<128x128xf32>, vector<8x128xf32> -> vector<8x128xf32>
    %c1_55 = arith.constant 1 : index
    %c0_56 = arith.constant 0 : index
    %c0_57 = arith.constant 0 : index
    %110 = vector.load %arg2[%c1_55, %c0_56, %c0_57] : memref<3x128x128xf32, #tpu.memory_space<vmem>>, vector<1x128x128xf32>
    %111 = vector.shape_cast %110 : vector<1x128x128xf32> to vector<128x128xf32>
    %cst_58 = arith.constant dense<0.000000e+00> : vector<8x128xf32>
    %112 = tpu.matmul %97, %111, %cst_58 {dimension_numbers = #tpu.dot_dimension_numbers<[1], [0], [0], [1], [0, 0, 1, 1], [], []>} : vector<8x128xf32>, vector<128x128xf32>, vector<8x128xf32> -> vector<8x128xf32>
    %c2_59 = arith.constant 2 : index
    %c0_60 = arith.constant 0 : index
    %c0_61 = arith.constant 0 : index
    %113 = vector.load %arg2[%c2_59, %c0_60, %c0_61] : memref<3x128x128xf32, #tpu.memory_space<vmem>>, vector<1x128x128xf32>
    %114 = vector.shape_cast %113 : vector<1x128x128xf32> to vector<128x128xf32>
    %cst_62 = arith.constant dense<0.000000e+00> : vector<8x128xf32>
    %115 = tpu.matmul %97, %114, %cst_62 {dimension_numbers = #tpu.dot_dimension_numbers<[1], [0], [0], [1], [0, 0, 1, 1], [], []>} : vector<8x128xf32>, vector<128x128xf32>, vector<8x128xf32> -> vector<8x128xf32>
    %116 = arith.addf %115, %3 : vector<8x128xf32>
    %117 = vector.extract_strided_slice %106 {offsets = [0, 0, 0], sizes = [1, 8, 128], strides = [1, 1, 1]} : vector<3x8x128xf32> to vector<1x8x128xf32>
    %118 = vector.shape_cast %117 : vector<1x8x128xf32> to vector<8x128xf32>
    %119 = arith.addf %118, %109 : vector<8x128xf32>
    %120 = arith.negf %119 : vector<8x128xf32>
    %121 = math.exp %120 : vector<8x128xf32>
    %cst_63 = arith.constant 1.000000e+00 : f32
    %122 = vector.broadcast %cst_63 : f32 to vector<8x128xf32>
    %123 = arith.addf %122, %121 : vector<8x128xf32>
    %124 = arith.divf %122, %123 : vector<8x128xf32>
    %125 = vector.extract_strided_slice %106 {offsets = [1, 0, 0], sizes = [1, 8, 128], strides = [1, 1, 1]} : vector<3x8x128xf32> to vector<1x8x128xf32>
    %126 = vector.shape_cast %125 : vector<1x8x128xf32> to vector<8x128xf32>
    %127 = arith.addf %126, %112 : vector<8x128xf32>
    %128 = arith.negf %127 : vector<8x128xf32>
    %129 = math.exp %128 : vector<8x128xf32>
    %cst_64 = arith.constant 1.000000e+00 : f32
    %130 = vector.broadcast %cst_64 : f32 to vector<8x128xf32>
    %131 = arith.addf %130, %129 : vector<8x128xf32>
    %132 = arith.divf %130, %131 : vector<8x128xf32>
    %133 = vector.extract_strided_slice %106 {offsets = [2, 0, 0], sizes = [1, 8, 128], strides = [1, 1, 1]} : vector<3x8x128xf32> to vector<1x8x128xf32>
    %134 = vector.shape_cast %133 : vector<1x8x128xf32> to vector<8x128xf32>
    %135 = arith.mulf %124, %116 : vector<8x128xf32>
    %136 = arith.addf %134, %135 : vector<8x128xf32>
    %137 = math.tanh %136 : vector<8x128xf32>
    %cst_65 = arith.constant 1.000000e+00 : f32
    %138 = vector.broadcast %cst_65 : f32 to vector<8x128xf32>
    %139 = arith.subf %138, %132 : vector<8x128xf32>
    %140 = arith.mulf %139, %137 : vector<8x128xf32>
    %141 = arith.mulf %132, %97 : vector<8x128xf32>
    %142 = arith.addf %140, %141 : vector<8x128xf32>
    %c2_i32 = arith.constant 2 : i32
    %143 = vector.broadcast %c2_i32 : i32 to vector<8x1xi32>
    %144 = arith.cmpi sgt, %0, %143 : vector<8x1xi32>
    %145 = vector.shape_cast %144 : vector<8x1xi1> to vector<8x1xi1>
    %146 = vector.broadcast %145 : vector<8x1xi1> to vector<8x128xi1>
    %147 = arith.select %146, %142, %97 : vector<8x128xi1>, vector<8x128xf32>
    %cst_66 = arith.constant 0.000000e+00 : f32
    %148 = vector.shape_cast %144 : vector<8x1xi1> to vector<8x1xi1>
    %149 = vector.broadcast %148 : vector<8x1xi1> to vector<8x128xi1>
    %150 = vector.broadcast %cst_66 : f32 to vector<8x128xf32>
    %151 = arith.select %149, %142, %150 : vector<8x128xi1>, vector<8x128xf32>
    %c0_67 = arith.constant 0 : index
    %c2_68 = arith.constant 2 : index
    %c0_69 = arith.constant 0 : index
    %152 = vector.load %arg4[%c0_67, %c2_68, %c0_69] : memref<8x8x128xf32, #tpu.memory_space<vmem>>, vector<8x1x128xf32>
    %153 = vector.shape_cast %152 : vector<8x1x128xf32> to vector<8x128xf32>
    %154 = vector.shape_cast %151 : vector<8x128xf32> to vector<8x1x128xf32>
    tpu.vector_store %arg4[%c0_67, %c2_68, %c0_69], %154 {strides = array<i32>} : memref<8x8x128xf32, #tpu.memory_space<vmem>>, vector<8x1x128xf32>,
    %c3 = arith.constant 3 : index
    %c0_70 = arith.constant 0 : index
    %c0_71 = arith.constant 0 : index
    %c0_72 = arith.constant 0 : index
    %155 = vector.load %arg0[%c3, %c0_70, %c0_71, %c0_72] : memref<8x3x8x128xf32, #tpu.memory_space<vmem>>, vector<1x3x8x128xf32>
    %156 = vector.shape_cast %155 : vector<1x3x8x128xf32> to vector<3x8x128xf32>
    %c0_73 = arith.constant 0 : index
    %c0_74 = arith.constant 0 : index
    %c0_75 = arith.constant 0 : index
    %157 = vector.load %arg2[%c0_73, %c0_74, %c0_75] : memref<3x128x128xf32, #tpu.memory_space<vmem>>, vector<1x128x128xf32>
    %158 = vector.shape_cast %157 : vector<1x128x128xf32> to vector<128x128xf32>
    %cst_76 = arith.constant dense<0.000000e+00> : vector<8x128xf32>
    %159 = tpu.matmul %147, %158, %cst_76 {dimension_numbers = #tpu.dot_dimension_numbers<[1], [0], [0], [1], [0, 0, 1, 1], [], []>} : vector<8x128xf32>, vector<128x128xf32>, vector<8x128xf32> -> vector<8x128xf32>
    %c1_77 = arith.constant 1 : index
    %c0_78 = arith.constant 0 : index
    %c0_79 = arith.constant 0 : index
    %160 = vector.load %arg2[%c1_77, %c0_78, %c0_79] : memref<3x128x128xf32, #tpu.memory_space<vmem>>, vector<1x128x128xf32>
    %161 = vector.shape_cast %160 : vector<1x128x128xf32> to vector<128x128xf32>
    %cst_80 = arith.constant dense<0.000000e+00> : vector<8x128xf32>
    %162 = tpu.matmul %147, %161, %cst_80 {dimension_numbers = #tpu.dot_dimension_numbers<[1], [0], [0], [1], [0, 0, 1, 1], [], []>} : vector<8x128xf32>, vector<128x128xf32>, vector<8x128xf32> -> vector<8x128xf32>
    %c2_81 = arith.constant 2 : index
    %c0_82 = arith.constant 0 : index
    %c0_83 = arith.constant 0 : index
    %163 = vector.load %arg2[%c2_81, %c0_82, %c0_83] : memref<3x128x128xf32, #tpu.memory_space<vmem>>, vector<1x128x128xf32>
    %164 = vector.shape_cast %163 : vector<1x128x128xf32> to vector<128x128xf32>
    %cst_84 = arith.constant dense<0.000000e+00> : vector<8x128xf32>
    %165 = tpu.matmul %147, %164, %cst_84 {dimension_numbers = #tpu.dot_dimension_numbers<[1], [0], [0], [1], [0, 0, 1, 1], [], []>} : vector<8x128xf32>, vector<128x128xf32>, vector<8x128xf32> -> vector<8x128xf32>
    %166 = arith.addf %165, %3 : vector<8x128xf32>
    %167 = vector.extract_strided_slice %156 {offsets = [0, 0, 0], sizes = [1, 8, 128], strides = [1, 1, 1]} : vector<3x8x128xf32> to vector<1x8x128xf32>
    %168 = vector.shape_cast %167 : vector<1x8x128xf32> to vector<8x128xf32>
    %169 = arith.addf %168, %159 : vector<8x128xf32>
    %170 = arith.negf %169 : vector<8x128xf32>
    %171 = math.exp %170 : vector<8x128xf32>
    %cst_85 = arith.constant 1.000000e+00 : f32
    %172 = vector.broadcast %cst_85 : f32 to vector<8x128xf32>
    %173 = arith.addf %172, %171 : vector<8x128xf32>
    %174 = arith.divf %172, %173 : vector<8x128xf32>
    %175 = vector.extract_strided_slice %156 {offsets = [1, 0, 0], sizes = [1, 8, 128], strides = [1, 1, 1]} : vector<3x8x128xf32> to vector<1x8x128xf32>
    %176 = vector.shape_cast %175 : vector<1x8x128xf32> to vector<8x128xf32>
    %177 = arith.addf %176, %162 : vector<8x128xf32>
    %178 = arith.negf %177 : vector<8x128xf32>
    %179 = math.exp %178 : vector<8x128xf32>
    %cst_86 = arith.constant 1.000000e+00 : f32
    %180 = vector.broadcast %cst_86 : f32 to vector<8x128xf32>
    %181 = arith.addf %180, %179 : vector<8x128xf32>
    %182 = arith.divf %180, %181 : vector<8x128xf32>
    %183 = vector.extract_strided_slice %156 {offsets = [2, 0, 0], sizes = [1, 8, 128], strides = [1, 1, 1]} : vector<3x8x128xf32> to vector<1x8x128xf32>
    %184 = vector.shape_cast %183 : vector<1x8x128xf32> to vector<8x128xf32>
    %185 = arith.mulf %174, %166 : vector<8x128xf32>
    %186 = arith.addf %184, %185 : vector<8x128xf32>
    %187 = math.tanh %186 : vector<8x128xf32>
    %cst_87 = arith.constant 1.000000e+00 : f32
    %188 = vector.broadcast %cst_87 : f32 to vector<8x128xf32>
    %189 = arith.subf %188, %182 : vector<8x128xf32>
    %190 = arith.mulf %189, %187 : vector<8x128xf32>
    %191 = arith.mulf %182, %147 : vector<8x128xf32>
    %192 = arith.addf %190, %191 : vector<8x128xf32>
    %c3_i32 = arith.constant 3 : i32
    %193 = vector.broadcast %c3_i32 : i32 to vector<8x1xi32>
    %194 = arith.cmpi sgt, %0, %193 : vector<8x1xi32>
    %195 = vector.shape_cast %194 : vector<8x1xi1> to vector<8x1xi1>
    %196 = vector.broadcast %195 : vector<8x1xi1> to vector<8x128xi1>
    %197 = arith.select %196, %192, %147 : vector<8x128xi1>, vector<8x128xf32>
    %cst_88 = arith.constant 0.000000e+00 : f32
    %198 = vector.shape_cast %194 : vector<8x1xi1> to vector<8x1xi1>
    %199 = vector.broadcast %198 : vector<8x1xi1> to vector<8x128xi1>
    %200 = vector.broadcast %cst_88 : f32 to vector<8x128xf32>
    %201 = arith.select %199, %192, %200 : vector<8x128xi1>, vector<8x128xf32>
    %c0_89 = arith.constant 0 : index
    %c3_90 = arith.constant 3 : index
    %c0_91 = arith.constant 0 : index
    %202 = vector.load %arg4[%c0_89, %c3_90, %c0_91] : memref<8x8x128xf32, #tpu.memory_space<vmem>>, vector<8x1x128xf32>
    %203 = vector.shape_cast %202 : vector<8x1x128xf32> to vector<8x128xf32>
    %204 = vector.shape_cast %201 : vector<8x128xf32> to vector<8x1x128xf32>
    tpu.vector_store %arg4[%c0_89, %c3_90, %c0_91], %204 {strides = array<i32>} : memref<8x8x128xf32, #tpu.memory_space<vmem>>, vector<8x1x128xf32>,
    %c4 = arith.constant 4 : index
    %c0_92 = arith.constant 0 : index
    %c0_93 = arith.constant 0 : index
    %c0_94 = arith.constant 0 : index
    %205 = vector.load %arg0[%c4, %c0_92, %c0_93, %c0_94] : memref<8x3x8x128xf32, #tpu.memory_space<vmem>>, vector<1x3x8x128xf32>
    %206 = vector.shape_cast %205 : vector<1x3x8x128xf32> to vector<3x8x128xf32>
    %c0_95 = arith.constant 0 : index
    %c0_96 = arith.constant 0 : index
    %c0_97 = arith.constant 0 : index
    %207 = vector.load %arg2[%c0_95, %c0_96, %c0_97] : memref<3x128x128xf32, #tpu.memory_space<vmem>>, vector<1x128x128xf32>
    %208 = vector.shape_cast %207 : vector<1x128x128xf32> to vector<128x128xf32>
    %cst_98 = arith.constant dense<0.000000e+00> : vector<8x128xf32>
    %209 = tpu.matmul %197, %208, %cst_98 {dimension_numbers = #tpu.dot_dimension_numbers<[1], [0], [0], [1], [0, 0, 1, 1], [], []>} : vector<8x128xf32>, vector<128x128xf32>, vector<8x128xf32> -> vector<8x128xf32>
    %c1_99 = arith.constant 1 : index
    %c0_100 = arith.constant 0 : index
    %c0_101 = arith.constant 0 : index
    %210 = vector.load %arg2[%c1_99, %c0_100, %c0_101] : memref<3x128x128xf32, #tpu.memory_space<vmem>>, vector<1x128x128xf32>
    %211 = vector.shape_cast %210 : vector<1x128x128xf32> to vector<128x128xf32>
    %cst_102 = arith.constant dense<0.000000e+00> : vector<8x128xf32>
    %212 = tpu.matmul %197, %211, %cst_102 {dimension_numbers = #tpu.dot_dimension_numbers<[1], [0], [0], [1], [0, 0, 1, 1], [], []>} : vector<8x128xf32>, vector<128x128xf32>, vector<8x128xf32> -> vector<8x128xf32>
    %c2_103 = arith.constant 2 : index
    %c0_104 = arith.constant 0 : index
    %c0_105 = arith.constant 0 : index
    %213 = vector.load %arg2[%c2_103, %c0_104, %c0_105] : memref<3x128x128xf32, #tpu.memory_space<vmem>>, vector<1x128x128xf32>
    %214 = vector.shape_cast %213 : vector<1x128x128xf32> to vector<128x128xf32>
    %cst_106 = arith.constant dense<0.000000e+00> : vector<8x128xf32>
    %215 = tpu.matmul %197, %214, %cst_106 {dimension_numbers = #tpu.dot_dimension_numbers<[1], [0], [0], [1], [0, 0, 1, 1], [], []>} : vector<8x128xf32>, vector<128x128xf32>, vector<8x128xf32> -> vector<8x128xf32>
    %216 = arith.addf %215, %3 : vector<8x128xf32>
    %217 = vector.extract_strided_slice %206 {offsets = [0, 0, 0], sizes = [1, 8, 128], strides = [1, 1, 1]} : vector<3x8x128xf32> to vector<1x8x128xf32>
    %218 = vector.shape_cast %217 : vector<1x8x128xf32> to vector<8x128xf32>
    %219 = arith.addf %218, %209 : vector<8x128xf32>
    %220 = arith.negf %219 : vector<8x128xf32>
    %221 = math.exp %220 : vector<8x128xf32>
    %cst_107 = arith.constant 1.000000e+00 : f32
    %222 = vector.broadcast %cst_107 : f32 to vector<8x128xf32>
    %223 = arith.addf %222, %221 : vector<8x128xf32>
    %224 = arith.divf %222, %223 : vector<8x128xf32>
    %225 = vector.extract_strided_slice %206 {offsets = [1, 0, 0], sizes = [1, 8, 128], strides = [1, 1, 1]} : vector<3x8x128xf32> to vector<1x8x128xf32>
    %226 = vector.shape_cast %225 : vector<1x8x128xf32> to vector<8x128xf32>
    %227 = arith.addf %226, %212 : vector<8x128xf32>
    %228 = arith.negf %227 : vector<8x128xf32>
    %229 = math.exp %228 : vector<8x128xf32>
    %cst_108 = arith.constant 1.000000e+00 : f32
    %230 = vector.broadcast %cst_108 : f32 to vector<8x128xf32>
    %231 = arith.addf %230, %229 : vector<8x128xf32>
    %232 = arith.divf %230, %231 : vector<8x128xf32>
    %233 = vector.extract_strided_slice %206 {offsets = [2, 0, 0], sizes = [1, 8, 128], strides = [1, 1, 1]} : vector<3x8x128xf32> to vector<1x8x128xf32>
    %234 = vector.shape_cast %233 : vector<1x8x128xf32> to vector<8x128xf32>
    %235 = arith.mulf %224, %216 : vector<8x128xf32>
    %236 = arith.addf %234, %235 : vector<8x128xf32>
    %237 = math.tanh %236 : vector<8x128xf32>
    %cst_109 = arith.constant 1.000000e+00 : f32
    %238 = vector.broadcast %cst_109 : f32 to vector<8x128xf32>
    %239 = arith.subf %238, %232 : vector<8x128xf32>
    %240 = arith.mulf %239, %237 : vector<8x128xf32>
    %241 = arith.mulf %232, %197 : vector<8x128xf32>
    %242 = arith.addf %240, %241 : vector<8x128xf32>
    %c4_i32 = arith.constant 4 : i32
    %243 = vector.broadcast %c4_i32 : i32 to vector<8x1xi32>
    %244 = arith.cmpi sgt, %0, %243 : vector<8x1xi32>
    %245 = vector.shape_cast %244 : vector<8x1xi1> to vector<8x1xi1>
    %246 = vector.broadcast %245 : vector<8x1xi1> to vector<8x128xi1>
    %247 = arith.select %246, %242, %197 : vector<8x128xi1>, vector<8x128xf32>
    %cst_110 = arith.constant 0.000000e+00 : f32
    %248 = vector.shape_cast %244 : vector<8x1xi1> to vector<8x1xi1>
    %249 = vector.broadcast %248 : vector<8x1xi1> to vector<8x128xi1>
    %250 = vector.broadcast %cst_110 : f32 to vector<8x128xf32>
    %251 = arith.select %249, %242, %250 : vector<8x128xi1>, vector<8x128xf32>
    %c0_111 = arith.constant 0 : index
    %c4_112 = arith.constant 4 : index
    %c0_113 = arith.constant 0 : index
    %252 = vector.load %arg4[%c0_111, %c4_112, %c0_113] : memref<8x8x128xf32, #tpu.memory_space<vmem>>, vector<8x1x128xf32>
    %253 = vector.shape_cast %252 : vector<8x1x128xf32> to vector<8x128xf32>
    %254 = vector.shape_cast %251 : vector<8x128xf32> to vector<8x1x128xf32>
    tpu.vector_store %arg4[%c0_111, %c4_112, %c0_113], %254 {strides = array<i32>} : memref<8x8x128xf32, #tpu.memory_space<vmem>>, vector<8x1x128xf32>,
    %c5 = arith.constant 5 : index
    %c0_114 = arith.constant 0 : index
    %c0_115 = arith.constant 0 : index
    %c0_116 = arith.constant 0 : index
    %255 = vector.load %arg0[%c5, %c0_114, %c0_115, %c0_116] : memref<8x3x8x128xf32, #tpu.memory_space<vmem>>, vector<1x3x8x128xf32>
    %256 = vector.shape_cast %255 : vector<1x3x8x128xf32> to vector<3x8x128xf32>
    %c0_117 = arith.constant 0 : index
    %c0_118 = arith.constant 0 : index
    %c0_119 = arith.constant 0 : index
    %257 = vector.load %arg2[%c0_117, %c0_118, %c0_119] : memref<3x128x128xf32, #tpu.memory_space<vmem>>, vector<1x128x128xf32>
    %258 = vector.shape_cast %257 : vector<1x128x128xf32> to vector<128x128xf32>
    %cst_120 = arith.constant dense<0.000000e+00> : vector<8x128xf32>
    %259 = tpu.matmul %247, %258, %cst_120 {dimension_numbers = #tpu.dot_dimension_numbers<[1], [0], [0], [1], [0, 0, 1, 1], [], []>} : vector<8x128xf32>, vector<128x128xf32>, vector<8x128xf32> -> vector<8x128xf32>
    %c1_121 = arith.constant 1 : index
    %c0_122 = arith.constant 0 : index
    %c0_123 = arith.constant 0 : index
    %260 = vector.load %arg2[%c1_121, %c0_122, %c0_123] : memref<3x128x128xf32, #tpu.memory_space<vmem>>, vector<1x128x128xf32>
    %261 = vector.shape_cast %260 : vector<1x128x128xf32> to vector<128x128xf32>
    %cst_124 = arith.constant dense<0.000000e+00> : vector<8x128xf32>
    %262 = tpu.matmul %247, %261, %cst_124 {dimension_numbers = #tpu.dot_dimension_numbers<[1], [0], [0], [1], [0, 0, 1, 1], [], []>} : vector<8x128xf32>, vector<128x128xf32>, vector<8x128xf32> -> vector<8x128xf32>
    %c2_125 = arith.constant 2 : index
    %c0_126 = arith.constant 0 : index
    %c0_127 = arith.constant 0 : index
    %263 = vector.load %arg2[%c2_125, %c0_126, %c0_127] : memref<3x128x128xf32, #tpu.memory_space<vmem>>, vector<1x128x128xf32>
    %264 = vector.shape_cast %263 : vector<1x128x128xf32> to vector<128x128xf32>
    %cst_128 = arith.constant dense<0.000000e+00> : vector<8x128xf32>
    %265 = tpu.matmul %247, %264, %cst_128 {dimension_numbers = #tpu.dot_dimension_numbers<[1], [0], [0], [1], [0, 0, 1, 1], [], []>} : vector<8x128xf32>, vector<128x128xf32>, vector<8x128xf32> -> vector<8x128xf32>
    %266 = arith.addf %265, %3 : vector<8x128xf32>
    %267 = vector.extract_strided_slice %256 {offsets = [0, 0, 0], sizes = [1, 8, 128], strides = [1, 1, 1]} : vector<3x8x128xf32> to vector<1x8x128xf32>
    %268 = vector.shape_cast %267 : vector<1x8x128xf32> to vector<8x128xf32>
    %269 = arith.addf %268, %259 : vector<8x128xf32>
    %270 = arith.negf %269 : vector<8x128xf32>
    %271 = math.exp %270 : vector<8x128xf32>
    %cst_129 = arith.constant 1.000000e+00 : f32
    %272 = vector.broadcast %cst_129 : f32 to vector<8x128xf32>
    %273 = arith.addf %272, %271 : vector<8x128xf32>
    %274 = arith.divf %272, %273 : vector<8x128xf32>
    %275 = vector.extract_strided_slice %256 {offsets = [1, 0, 0], sizes = [1, 8, 128], strides = [1, 1, 1]} : vector<3x8x128xf32> to vector<1x8x128xf32>
    %276 = vector.shape_cast %275 : vector<1x8x128xf32> to vector<8x128xf32>
    %277 = arith.addf %276, %262 : vector<8x128xf32>
    %278 = arith.negf %277 : vector<8x128xf32>
    %279 = math.exp %278 : vector<8x128xf32>
    %cst_130 = arith.constant 1.000000e+00 : f32
    %280 = vector.broadcast %cst_130 : f32 to vector<8x128xf32>
    %281 = arith.addf %280, %279 : vector<8x128xf32>
    %282 = arith.divf %280, %281 : vector<8x128xf32>
    %283 = vector.extract_strided_slice %256 {offsets = [2, 0, 0], sizes = [1, 8, 128], strides = [1, 1, 1]} : vector<3x8x128xf32> to vector<1x8x128xf32>
    %284 = vector.shape_cast %283 : vector<1x8x128xf32> to vector<8x128xf32>
    %285 = arith.mulf %274, %266 : vector<8x128xf32>
    %286 = arith.addf %284, %285 : vector<8x128xf32>
    %287 = math.tanh %286 : vector<8x128xf32>
    %cst_131 = arith.constant 1.000000e+00 : f32
    %288 = vector.broadcast %cst_131 : f32 to vector<8x128xf32>
    %289 = arith.subf %288, %282 : vector<8x128xf32>
    %290 = arith.mulf %289, %287 : vector<8x128xf32>
    %291 = arith.mulf %282, %247 : vector<8x128xf32>
    %292 = arith.addf %290, %291 : vector<8x128xf32>
    %c5_i32 = arith.constant 5 : i32
    %293 = vector.broadcast %c5_i32 : i32 to vector<8x1xi32>
    %294 = arith.cmpi sgt, %0, %293 : vector<8x1xi32>
    %295 = vector.shape_cast %294 : vector<8x1xi1> to vector<8x1xi1>
    %296 = vector.broadcast %295 : vector<8x1xi1> to vector<8x128xi1>
    %297 = arith.select %296, %292, %247 : vector<8x128xi1>, vector<8x128xf32>
    %cst_132 = arith.constant 0.000000e+00 : f32
    %298 = vector.shape_cast %294 : vector<8x1xi1> to vector<8x1xi1>
    %299 = vector.broadcast %298 : vector<8x1xi1> to vector<8x128xi1>
    %300 = vector.broadcast %cst_132 : f32 to vector<8x128xf32>
    %301 = arith.select %299, %292, %300 : vector<8x128xi1>, vector<8x128xf32>
    %c0_133 = arith.constant 0 : index
    %c5_134 = arith.constant 5 : index
    %c0_135 = arith.constant 0 : index
    %302 = vector.load %arg4[%c0_133, %c5_134, %c0_135] : memref<8x8x128xf32, #tpu.memory_space<vmem>>, vector<8x1x128xf32>
    %303 = vector.shape_cast %302 : vector<8x1x128xf32> to vector<8x128xf32>
    %304 = vector.shape_cast %301 : vector<8x128xf32> to vector<8x1x128xf32>
    tpu.vector_store %arg4[%c0_133, %c5_134, %c0_135], %304 {strides = array<i32>} : memref<8x8x128xf32, #tpu.memory_space<vmem>>, vector<8x1x128xf32>,
    %c6 = arith.constant 6 : index
    %c0_136 = arith.constant 0 : index
    %c0_137 = arith.constant 0 : index
    %c0_138 = arith.constant 0 : index
    %305 = vector.load %arg0[%c6, %c0_136, %c0_137, %c0_138] : memref<8x3x8x128xf32, #tpu.memory_space<vmem>>, vector<1x3x8x128xf32>
    %306 = vector.shape_cast %305 : vector<1x3x8x128xf32> to vector<3x8x128xf32>
    %c0_139 = arith.constant 0 : index
    %c0_140 = arith.constant 0 : index
    %c0_141 = arith.constant 0 : index
    %307 = vector.load %arg2[%c0_139, %c0_140, %c0_141] : memref<3x128x128xf32, #tpu.memory_space<vmem>>, vector<1x128x128xf32>
    %308 = vector.shape_cast %307 : vector<1x128x128xf32> to vector<128x128xf32>
    %cst_142 = arith.constant dense<0.000000e+00> : vector<8x128xf32>
    %309 = tpu.matmul %297, %308, %cst_142 {dimension_numbers = #tpu.dot_dimension_numbers<[1], [0], [0], [1], [0, 0, 1, 1], [], []>} : vector<8x128xf32>, vector<128x128xf32>, vector<8x128xf32> -> vector<8x128xf32>
    %c1_143 = arith.constant 1 : index
    %c0_144 = arith.constant 0 : index
    %c0_145 = arith.constant 0 : index
    %310 = vector.load %arg2[%c1_143, %c0_144, %c0_145] : memref<3x128x128xf32, #tpu.memory_space<vmem>>, vector<1x128x128xf32>
    %311 = vector.shape_cast %310 : vector<1x128x128xf32> to vector<128x128xf32>
    %cst_146 = arith.constant dense<0.000000e+00> : vector<8x128xf32>
    %312 = tpu.matmul %297, %311, %cst_146 {dimension_numbers = #tpu.dot_dimension_numbers<[1], [0], [0], [1], [0, 0, 1, 1], [], []>} : vector<8x128xf32>, vector<128x128xf32>, vector<8x128xf32> -> vector<8x128xf32>
    %c2_147 = arith.constant 2 : index
    %c0_148 = arith.constant 0 : index
    %c0_149 = arith.constant 0 : index
    %313 = vector.load %arg2[%c2_147, %c0_148, %c0_149] : memref<3x128x128xf32, #tpu.memory_space<vmem>>, vector<1x128x128xf32>
    %314 = vector.shape_cast %313 : vector<1x128x128xf32> to vector<128x128xf32>
    %cst_150 = arith.constant dense<0.000000e+00> : vector<8x128xf32>
    %315 = tpu.matmul %297, %314, %cst_150 {dimension_numbers = #tpu.dot_dimension_numbers<[1], [0], [0], [1], [0, 0, 1, 1], [], []>} : vector<8x128xf32>, vector<128x128xf32>, vector<8x128xf32> -> vector<8x128xf32>
    %316 = arith.addf %315, %3 : vector<8x128xf32>
    %317 = vector.extract_strided_slice %306 {offsets = [0, 0, 0], sizes = [1, 8, 128], strides = [1, 1, 1]} : vector<3x8x128xf32> to vector<1x8x128xf32>
    %318 = vector.shape_cast %317 : vector<1x8x128xf32> to vector<8x128xf32>
    %319 = arith.addf %318, %309 : vector<8x128xf32>
    %320 = arith.negf %319 : vector<8x128xf32>
    %321 = math.exp %320 : vector<8x128xf32>
    %cst_151 = arith.constant 1.000000e+00 : f32
    %322 = vector.broadcast %cst_151 : f32 to vector<8x128xf32>
    %323 = arith.addf %322, %321 : vector<8x128xf32>
    %324 = arith.divf %322, %323 : vector<8x128xf32>
    %325 = vector.extract_strided_slice %306 {offsets = [1, 0, 0], sizes = [1, 8, 128], strides = [1, 1, 1]} : vector<3x8x128xf32> to vector<1x8x128xf32>
    %326 = vector.shape_cast %325 : vector<1x8x128xf32> to vector<8x128xf32>
    %327 = arith.addf %326, %312 : vector<8x128xf32>
    %328 = arith.negf %327 : vector<8x128xf32>
    %329 = math.exp %328 : vector<8x128xf32>
    %cst_152 = arith.constant 1.000000e+00 : f32
    %330 = vector.broadcast %cst_152 : f32 to vector<8x128xf32>
    %331 = arith.addf %330, %329 : vector<8x128xf32>
    %332 = arith.divf %330, %331 : vector<8x128xf32>
    %333 = vector.extract_strided_slice %306 {offsets = [2, 0, 0], sizes = [1, 8, 128], strides = [1, 1, 1]} : vector<3x8x128xf32> to vector<1x8x128xf32>
    %334 = vector.shape_cast %333 : vector<1x8x128xf32> to vector<8x128xf32>
    %335 = arith.mulf %324, %316 : vector<8x128xf32>
    %336 = arith.addf %334, %335 : vector<8x128xf32>
    %337 = math.tanh %336 : vector<8x128xf32>
    %cst_153 = arith.constant 1.000000e+00 : f32
    %338 = vector.broadcast %cst_153 : f32 to vector<8x128xf32>
    %339 = arith.subf %338, %332 : vector<8x128xf32>
    %340 = arith.mulf %339, %337 : vector<8x128xf32>
    %341 = arith.mulf %332, %297 : vector<8x128xf32>
    %342 = arith.addf %340, %341 : vector<8x128xf32>
    %c6_i32 = arith.constant 6 : i32
    %343 = vector.broadcast %c6_i32 : i32 to vector<8x1xi32>
    %344 = arith.cmpi sgt, %0, %343 : vector<8x1xi32>
    %345 = vector.shape_cast %344 : vector<8x1xi1> to vector<8x1xi1>
    %346 = vector.broadcast %345 : vector<8x1xi1> to vector<8x128xi1>
    %347 = arith.select %346, %342, %297 : vector<8x128xi1>, vector<8x128xf32>
    %cst_154 = arith.constant 0.000000e+00 : f32
    %348 = vector.shape_cast %344 : vector<8x1xi1> to vector<8x1xi1>
    %349 = vector.broadcast %348 : vector<8x1xi1> to vector<8x128xi1>
    %350 = vector.broadcast %cst_154 : f32 to vector<8x128xf32>
    %351 = arith.select %349, %342, %350 : vector<8x128xi1>, vector<8x128xf32>
    %c0_155 = arith.constant 0 : index
    %c6_156 = arith.constant 6 : index
    %c0_157 = arith.constant 0 : index
    %352 = vector.load %arg4[%c0_155, %c6_156, %c0_157] : memref<8x8x128xf32, #tpu.memory_space<vmem>>, vector<8x1x128xf32>
    %353 = vector.shape_cast %352 : vector<8x1x128xf32> to vector<8x128xf32>
    %354 = vector.shape_cast %351 : vector<8x128xf32> to vector<8x1x128xf32>
    tpu.vector_store %arg4[%c0_155, %c6_156, %c0_157], %354 {strides = array<i32>} : memref<8x8x128xf32, #tpu.memory_space<vmem>>, vector<8x1x128xf32>,
    %c7 = arith.constant 7 : index
    %c0_158 = arith.constant 0 : index
    %c0_159 = arith.constant 0 : index
    %c0_160 = arith.constant 0 : index
    %355 = vector.load %arg0[%c7, %c0_158, %c0_159, %c0_160] : memref<8x3x8x128xf32, #tpu.memory_space<vmem>>, vector<1x3x8x128xf32>
    %356 = vector.shape_cast %355 : vector<1x3x8x128xf32> to vector<3x8x128xf32>
    %c0_161 = arith.constant 0 : index
    %c0_162 = arith.constant 0 : index
    %c0_163 = arith.constant 0 : index
    %357 = vector.load %arg2[%c0_161, %c0_162, %c0_163] : memref<3x128x128xf32, #tpu.memory_space<vmem>>, vector<1x128x128xf32>
    %358 = vector.shape_cast %357 : vector<1x128x128xf32> to vector<128x128xf32>
    %cst_164 = arith.constant dense<0.000000e+00> : vector<8x128xf32>
    %359 = tpu.matmul %347, %358, %cst_164 {dimension_numbers = #tpu.dot_dimension_numbers<[1], [0], [0], [1], [0, 0, 1, 1], [], []>} : vector<8x128xf32>, vector<128x128xf32>, vector<8x128xf32> -> vector<8x128xf32>
    %c1_165 = arith.constant 1 : index
    %c0_166 = arith.constant 0 : index
    %c0_167 = arith.constant 0 : index
    %360 = vector.load %arg2[%c1_165, %c0_166, %c0_167] : memref<3x128x128xf32, #tpu.memory_space<vmem>>, vector<1x128x128xf32>
    %361 = vector.shape_cast %360 : vector<1x128x128xf32> to vector<128x128xf32>
    %cst_168 = arith.constant dense<0.000000e+00> : vector<8x128xf32>
    %362 = tpu.matmul %347, %361, %cst_168 {dimension_numbers = #tpu.dot_dimension_numbers<[1], [0], [0], [1], [0, 0, 1, 1], [], []>} : vector<8x128xf32>, vector<128x128xf32>, vector<8x128xf32> -> vector<8x128xf32>
    %c2_169 = arith.constant 2 : index
    %c0_170 = arith.constant 0 : index
    %c0_171 = arith.constant 0 : index
    %363 = vector.load %arg2[%c2_169, %c0_170, %c0_171] : memref<3x128x128xf32, #tpu.memory_space<vmem>>, vector<1x128x128xf32>
    %364 = vector.shape_cast %363 : vector<1x128x128xf32> to vector<128x128xf32>
    %cst_172 = arith.constant dense<0.000000e+00> : vector<8x128xf32>
    %365 = tpu.matmul %347, %364, %cst_172 {dimension_numbers = #tpu.dot_dimension_numbers<[1], [0], [0], [1], [0, 0, 1, 1], [], []>} : vector<8x128xf32>, vector<128x128xf32>, vector<8x128xf32> -> vector<8x128xf32>
    %366 = arith.addf %365, %3 : vector<8x128xf32>
    %367 = vector.extract_strided_slice %356 {offsets = [0, 0, 0], sizes = [1, 8, 128], strides = [1, 1, 1]} : vector<3x8x128xf32> to vector<1x8x128xf32>
    %368 = vector.shape_cast %367 : vector<1x8x128xf32> to vector<8x128xf32>
    %369 = arith.addf %368, %359 : vector<8x128xf32>
    %370 = arith.negf %369 : vector<8x128xf32>
    %371 = math.exp %370 : vector<8x128xf32>
    %cst_173 = arith.constant 1.000000e+00 : f32
    %372 = vector.broadcast %cst_173 : f32 to vector<8x128xf32>
    %373 = arith.addf %372, %371 : vector<8x128xf32>
    %374 = arith.divf %372, %373 : vector<8x128xf32>
    %375 = vector.extract_strided_slice %356 {offsets = [1, 0, 0], sizes = [1, 8, 128], strides = [1, 1, 1]} : vector<3x8x128xf32> to vector<1x8x128xf32>
    %376 = vector.shape_cast %375 : vector<1x8x128xf32> to vector<8x128xf32>
    %377 = arith.addf %376, %362 : vector<8x128xf32>
    %378 = arith.negf %377 : vector<8x128xf32>
    %379 = math.exp %378 : vector<8x128xf32>
    %cst_174 = arith.constant 1.000000e+00 : f32
    %380 = vector.broadcast %cst_174 : f32 to vector<8x128xf32>
    %381 = arith.addf %380, %379 : vector<8x128xf32>
    %382 = arith.divf %380, %381 : vector<8x128xf32>
    %383 = vector.extract_strided_slice %356 {offsets = [2, 0, 0], sizes = [1, 8, 128], strides = [1, 1, 1]} : vector<3x8x128xf32> to vector<1x8x128xf32>
    %384 = vector.shape_cast %383 : vector<1x8x128xf32> to vector<8x128xf32>
    %385 = arith.mulf %374, %366 : vector<8x128xf32>
    %386 = arith.addf %384, %385 : vector<8x128xf32>
    %387 = math.tanh %386 : vector<8x128xf32>
    %cst_175 = arith.constant 1.000000e+00 : f32
    %388 = vector.broadcast %cst_175 : f32 to vector<8x128xf32>
    %389 = arith.subf %388, %382 : vector<8x128xf32>
    %390 = arith.mulf %389, %387 : vector<8x128xf32>
    %391 = arith.mulf %382, %347 : vector<8x128xf32>
    %392 = arith.addf %390, %391 : vector<8x128xf32>
    %c7_i32 = arith.constant 7 : i32
    %393 = vector.broadcast %c7_i32 : i32 to vector<8x1xi32>
    %394 = arith.cmpi sgt, %0, %393 : vector<8x1xi32>
    %395 = vector.shape_cast %394 : vector<8x1xi1> to vector<8x1xi1>
    %396 = vector.broadcast %395 : vector<8x1xi1> to vector<8x128xi1>
    %397 = arith.select %396, %392, %347 : vector<8x128xi1>, vector<8x128xf32>
    %cst_176 = arith.constant 0.000000e+00 : f32
    %398 = vector.shape_cast %394 : vector<8x1xi1> to vector<8x1xi1>
    %399 = vector.broadcast %398 : vector<8x1xi1> to vector<8x128xi1>
    %400 = vector.broadcast %cst_176 : f32 to vector<8x128xf32>
    %401 = arith.select %399, %392, %400 : vector<8x128xi1>, vector<8x128xf32>
    %c0_177 = arith.constant 0 : index
    %c7_178 = arith.constant 7 : index
    %c0_179 = arith.constant 0 : index
    %402 = vector.load %arg4[%c0_177, %c7_178, %c0_179] : memref<8x8x128xf32, #tpu.memory_space<vmem>>, vector<8x1x128xf32>
    %403 = vector.shape_cast %402 : vector<8x1x128xf32> to vector<8x128xf32>
    %404 = vector.shape_cast %401 : vector<8x128xf32> to vector<8x1x128xf32>
    tpu.vector_store %arg4[%c0_177, %c7_178, %c0_179], %404 {strides = array<i32>} : memref<8x8x128xf32, #tpu.memory_space<vmem>>, vector<8x1x128xf32>,
    %c0_180 = arith.constant 0 : index
    %c0_181 = arith.constant 0 : index
    %c0_182 = arith.constant 0 : index
    %405 = vector.load %arg5[%c0_180, %c0_181, %c0_182] : memref<1x8x128xf32, #tpu.memory_space<vmem>>, vector<1x8x128xf32>
    %406 = vector.shape_cast %405 : vector<1x8x128xf32> to vector<8x128xf32>
    %407 = vector.shape_cast %397 : vector<8x128xf32> to vector<1x8x128xf32>
    tpu.vector_store %arg5[%c0_180, %c0_181, %c0_182], %407 {strides = array<i32>} : memref<1x8x128xf32, #tpu.memory_space<vmem>>, vector<1x8x128xf32>,
    return
  }
}

</mosaic_0001>

<bundles_post_ra>
// kernel: encoder_forward.1
= control target key start
LH: loop header
LB: loop body
LE: loop exit
PB: predicated region body
PF: predicated region fallthrough
CT: control target
= control target key end

     0   :  { %v5133_v0 = vmov 0.0|0.0   ;;  %vm5134_vm0 = vmmov 0   ;;  %v5135_v6 = vmov 0.0   ;;  %v5136_v7 = vmov 0   ;;  %s6576_s2 = inlined_call_operand.vmem [shape: f32[3,128,128], index: 2, kind: input, shape index: {}]   ;;  %s6577_s1 = inlined_call_operand.vmem [shape: s32[8,1], index: 1, kind: input, shape index: {}]   ;;  %s6578_s0 = inlined_call_operand.vmem [shape: f32[8,3,8,128], index: 0, kind: input, shape index: {}]   ;;  %s6579_s3 = inlined_call_operand.vmem [shape: f32[1,128], index: 3, kind: input, shape index: {}]   ;;  %s6580_s4 = inlined_call_operand.vmem [shape: f32[8,8,128], index: 4, kind: output, shape index: {0}]   ;;  %s6581_s5 = inlined_call_operand.vmem [shape: f32[1,8,128], index: 5, kind: output, shape index: {1}]  }
   0x1   :  { %4469 = vmatprep.subr.bf16.mxu0 %v5133_v0  ;;  %v30_v1 = vld [vmem:[%s6576_s2] sm:$0xff]  ;;  %v31_v2 = vld [vmem:[%s6576_s2 + $0x8] sm:$0xff]  ;;  %v32_v3 = vld [vmem:[%s6576_s2 + $0x10] sm:$0xff]  ;;  %4493 = vmatprep.subr.bf16.mxu1 %v5133_v0 }
   0x2   :  { %v5179_v4 = vpack.c.bf16 %v31_v2, %v30_v1  ;;  %v33_v5 = vld [vmem:[%s6576_s2 + $0x18] sm:$0xff]  ;;  %3661 = vmatprep.mubr.msk.f32.mxu0 %vm5134_vm0, %v5135_v6  ;;  %3696 = vmatprep.mubr.msk.f32.mxu1 %vm5134_vm0, %v5135_v6  ;;  %v2893_v9 = vld [vmem:[%s6576_s2 + $0x80] sm:$0xff]  ;;  %v2894_v10 = vld [vmem:[%s6576_s2 + $0x88] sm:$0xff] }
   0x3   :  { %5050 = vset.pattern.permute.xlu0 %v5136_v7  ;;  %5051 = vset.pattern.permute.xlu1 %v5136_v7  ;;  %v5191_v8 = vpack.c.bf16 %v33_v5, %v32_v3  ;;  %v34_v11 = vld [vmem:[%s6576_s2 + $0x20] sm:$0xff]  ;;  %v35_v12 = vld [vmem:[%s6576_s2 + $0x28] sm:$0xff]  ;;  %v5206_v13 = vpack.c.bf16 %v2894_v10, %v2893_v9  ;;  %v2895_v14 = vld [vmem:[%s6576_s2 + $0x90] sm:$0xff] }
   0x4   :  { %4471 = vmatpush3.bf16.msra.mxu0 %v5179_v4  ;;  %v2896_v15 = vld [vmem:[%s6576_s2 + $0x98] sm:$0xff]  ;;  %v5218_v17 = vpack.c.bf16 %v35_v12, %v34_v11  ;;  %v2897_v18 = vld [vmem:[%s6576_s2 + $0xa0] sm:$0xff]  ;;  %v2898_v19 = vld [vmem:[%s6576_s2 + $0xa8] sm:$0xff] }
   0x5   :  { %4472 = vmatprep.subr.bf16.mxu0 %v5133_v0  ;;  %4495 = vmatpush3.bf16.msra.mxu1 %v5206_v13  ;;  %v5215_v16 = vpack.c.bf16 %v2896_v15, %v2895_v14  ;;  %v36_v20 = vld [vmem:[%s6576_s2 + $0x30] sm:$0xff]  ;;  %v37_v21 = vld [vmem:[%s6576_s2 + $0x38] sm:$0xff]  ;;  %v5235_v22 = vpack.c.bf16 %v2898_v19, %v2897_v18  ;;  %v38_v26 = vld [vmem:[%s6576_s2 + $0x40] sm:$0xff] }
   0x6   :  { %4496 = vmatprep.subr.bf16.mxu1 %v5133_v0  ;;  %v5238_v23 = vpack.c.bf16 %v37_v21, %v36_v20  ;;  %v2899_v24 = vld [vmem:[%s6576_s2 + $0xb0] sm:$0xff]  ;;  %v2900_v25 = vld [vmem:[%s6576_s2 + $0xb8] sm:$0xff]  ;;  %v39_v27 = vld [vmem:[%s6576_s2 + $0x48] sm:$0xff] }
   0x7   :  { %v5255_v28 = vpack.c.bf16 %v2900_v25, %v2899_v24  ;;  %v5258_v29 = vpack.c.bf16 %v39_v27, %v38_v26  ;;  %v2901_v30 = vld [vmem:[%s6576_s2 + $0xc0] sm:$0xff]  ;;  %v2902_v31 = vld [vmem:[%s6576_s2 + $0xc8] sm:$0xff]  ;;  %v40_v32 = vld [vmem:[%s6576_s2 + $0x50] sm:$0xff] }
   0x8   :  { %4474 = vmatpush3.bf16.msra.mxu0 %v5191_v8  ;;  %v41_v33 = vld [vmem:[%s6576_s2 + $0x58] sm:$0xff]  ;;  %v5277_v34 = vld [vmem:[%s6577_s1] sm:$0xff]  ;;  %v5281_v35 = vpack.c.bf16 %v2902_v31, %v2901_v30  ;;  %v2903_v38 = vld [vmem:[%s6576_s2 + $0xd0] sm:$0xff] }
   0x9   :  { %4475 = vmatprep.subr.bf16.mxu0 %v5133_v0  ;;  %4498 = vmatpush3.bf16.msra.mxu1 %v5215_v16  ;;  %vm311_vm1 = vcmp.gt.s32.totalorder %v5277_v34, 0  ;;  %vm667_vm2 = vcmp.gt.s32.totalorder %v5277_v34, 1  ;;  %v5286_v37 = vpack.c.bf16 %v41_v33, %v40_v32  ;;  %v2904_v39 = vld [vmem:[%s6576_s2 + $0xd8] sm:$0xff]  ;;  %v42_v40 = vld [vmem:[%s6576_s2 + $0x60] sm:$0xff]  ;;  %v43_v41 = vld [vmem:[%s6576_s2 + $0x68] sm:$0xff]  ;;  %vm1738_vm3 = vcmp.gt.s32.totalorder %v5277_v34, 4 }
   0xa   :  { %4499 = vmatprep.subr.bf16.mxu1 %v5133_v0  ;;  %v312_v36 = vsel %vm311_vm1, 1, %v5136_v7  ;;  %v668_v42 = vsel %vm667_vm2, 1, %v5136_v7  ;;  %v5304_v43 = vpack.c.bf16 %v2904_v39, %v2903_v38  ;;  %v5308_v44 = vpack.c.bf16 %v43_v41, %v42_v40  ;;  %v2905_v45 = vld [vmem:[%s6576_s2 + $0xe0] sm:$0xff]  ;;  %v2906_v46 = vld [vmem:[%s6576_s2 + $0xe8] sm:$0xff]  ;;  %v44_v47 = vld [vmem:[%s6576_s2 + $0x70] sm:$0xff] }
   0xb   :  { %314 = vperm.xlu0 %5050, %v312_v36   ;;  %v45_v48 = vld [vmem:[%s6576_s2 + $0x78] sm:$0xff]  ;;  %v1739_v49 = vsel %vm1738_vm3, 1, %v5136_v7  ;;  %v5326_v50 = vpack.c.bf16 %v2906_v46, %v2905_v45  ;;  %vm2452_vm4 = vcmp.gt.s32.totalorder %v5277_v34, 6  ;;  %v2907_v52 = vld [vmem:[%s6576_s2 + $0xf0] sm:$0xff]  ;;  %v2909_v54 = vld [vmem:[%s6576_s2 + $0x100] sm:$0xff]  ;;  %vm1024_vm6 = vcmp.gt.s32.totalorder %v5277_v34, 2 }
   0xc   :  { %4477 = vmatpush3.bf16.msra.mxu0 %v5218_v17  ;;  %v5330_v51 = vpack.c.bf16 %v45_v48, %v44_v47  ;;  %v2908_v53 = vld [vmem:[%s6576_s2 + $0xf8] sm:$0xff]  ;;  %v2910_v55 = vld [vmem:[%s6576_s2 + $0x108] sm:$0xff]  ;;  %v2453_v56 = vsel %vm2452_vm4, 1, %v5136_v7  ;;  %v2911_v59 = vld [vmem:[%s6576_s2 + $0x110] sm:$0xff]  ;;  %vm1381_vm7 = vcmp.gt.s32.totalorder %v5277_v34, 3  ;;  %vm2095_vm8 = vcmp.gt.s32.totalorder %v5277_v34, 5 }
   0xd   :  { %4478 = vmatprep.subr.bf16.mxu0 %v5133_v0  ;;  %4501 = vmatpush3.bf16.msra.mxu1 %v5235_v22  ;;  %v5348_v57 = vpack.c.bf16 %v2908_v53, %v2907_v52  ;;  %v5351_v58 = vpack.c.bf16 %v2910_v55, %v2909_v54  ;;  %v2912_v60 = vld [vmem:[%s6576_s2 + $0x118] sm:$0xff]  ;;  %v2913_v62 = vld [vmem:[%s6576_s2 + $0x120] sm:$0xff]  ;;  %v2914_v63 = vld [vmem:[%s6576_s2 + $0x128] sm:$0xff]  ;;  %vm2809_vm9 = vcmp.gt.s32.totalorder %v5277_v34, 7 }
   0xe   :  { %4502 = vmatprep.subr.bf16.mxu1 %v5133_v0  ;;  %v5364_v61 = vpack.c.bf16 %v2912_v60, %v2911_v59  ;;  %v5381_v1 = vpack.c.bf16 %v2914_v63, %v2913_v62  ;;  %v2915_v2 = vld [vmem:[%s6576_s2 + $0x130] sm:$0xff]  ;;  %v2916_v3 = vld [vmem:[%s6576_s2 + $0x138] sm:$0xff]  ;;  %v2917_v9 = vld [vmem:[%s6576_s2 + $0x140] sm:$0xff]  ;;  %v5137_v60 = vmov 1966171168   ;;  %v323_v63 = vlaneseq }
   0xf   :  { %670 = vperm.xlu0 %5050, %v668_v42   ;;  %v5393_v5 = vpack.c.bf16 %v2916_v3, %v2915_v2  ;;  %v2918_v10 = vld [vmem:[%s6576_s2 + $0x148] sm:$0xff]  ;;  %v2919_v12 = vld [vmem:[%s6576_s2 + $0x150] sm:$0xff]  ;;  %v2920_v14 = vld [vmem:[%s6576_s2 + $0x158] sm:$0xff]  ;;  %v321_v62 = vunpack.c.l.s4 %v5137_v60 }
  0x10   :  { %4480 = vmatpush3.bf16.msra.mxu0 %v5238_v23  ;;  %v5405_v11 = vpack.c.bf16 %v2918_v10, %v2917_v9  ;;  %v5417_v15 = vpack.c.bf16 %v2920_v14, %v2919_v12  ;;  %v2921_v18 = vld [vmem:[%s6576_s2 + $0x160] sm:$0xff]  ;;  %v2922_v19 = vld [vmem:[%s6576_s2 + $0x168] sm:$0xff]  ;;  %v2923_v21 = vld [vmem:[%s6576_s2 + $0x170] sm:$0xff]  ;;  %v324_v9 = vshrl.u32 %v323_v63, 7 }
  0x11   :  { %4481 = vmatprep.subr.bf16.mxu0 %v5133_v0  ;;  %4504 = vmatpush3.bf16.msra.mxu1 %v5255_v28  ;;  %v5429_v20 = vpack.c.bf16 %v2922_v19, %v2921_v18  ;;  %v2924_v24 = vld [vmem:[%s6576_s2 + $0x178] sm:$0xff]  ;;  %v27_v26 = vld [vmem:[%s6578_s0] sm:$0xff]  ;;  %v28_v38 = vld [vmem:[%s6578_s0 + $0x8] sm:$0xff]  ;;  %v322_v3 = vunpack.c.0.s8 %v321_v62 }
  0x12   :  { %4505 = vmatprep.subr.bf16.mxu1 %v5133_v0  ;;  %v5441_v25 = vpack.c.bf16 %v2924_v24, %v2923_v21  ;;  %v5479_v47 = vld [vmem:[%s6579_s3] ss:$0 sm:$0xff]  ;;  %v29_v54 = vld [vmem:[%s6578_s0 + $0x10] sm:$0xff] }
  0x13   :  { %1741 = vperm.xlu0 %5050, %v1739_v49   ;;  %v5487_v19 = vsub.s32 %v322_v3, %v324_v9 }
  0x14   :  { %4483 = vmatpush3.bf16.msra.mxu0 %v5258_v29 }
  0x15   :  { %4484 = vmatprep.subr.bf16.mxu0 %v5133_v0  ;;  %4507 = vmatpush3.bf16.msra.mxu1 %v5281_v35 }
  0x16   :  { %4508 = vmatprep.subr.bf16.mxu1 %v5133_v0 }
  0x17   :  { %2455 = vperm.xlu0 %5050, %v2453_v56  }
  0x18   :  { %4486 = vmatpush3.bf16.msra.mxu0 %v5286_v37 }
  0x19   :  { %4487 = vmatprep.subr.bf16.mxu0 %v5133_v0  ;;  %4510 = vmatpush3.bf16.msra.mxu1 %v5304_v43 }
  0x1a   :  { %4511 = vmatprep.subr.bf16.mxu1 %v5133_v0 }
  0x1c   :  { %4489 = vmatpush3.bf16.msra.mxu0 %v5308_v44 }
  0x1d   :  { %4490 = vmatprep.subr.bf16.mxu0 %v5133_v0  ;;  %4513 = vmatpush3.bf16.msra.mxu1 %v5326_v50 }
  0x1e   :  { %4514 = vmatprep.subr.bf16.mxu1 %v5133_v0 }
  0x20   :  { %4492 = vmatpush3.bf16.msra.mxu0 %v5330_v51 }
  0x21   :  { %4517 = vmatprep.subr.bf16.mxu0 %v5133_v0  ;;  %4516 = vmatpush3.bf16.msra.mxu1 %v5348_v57 }
  0x22   :  { %4541 = vmatprep.subr.bf16.mxu1 %v5133_v0 }
  0x23   :  { %3662 = vmatmul.mubr.f32.vlgmr.msra.gmra.mrb[0].mxu0 %v5135_v6 }
  0x24   :  { %4519 = vmatpush3.bf16.msra.mxu0 %v5351_v58  ;;  %3731 = vmatprep.mubr.msk.f32.mxu0 %vm5134_vm0, %v5135_v6 }
  0x25   :  { %4520 = vmatprep.subr.bf16.mxu0 %v5133_v0  ;;  %3697 = vmatmul.mubr.f32.vlgmr.msra.gmra.mrb[0].mxu1 %v5135_v6 }
  0x26   :  { %4543 = vmatpush3.bf16.msra.mxu1 %v5179_v4  ;;  %3766 = vmatprep.mubr.msk.f32.mxu1 %vm5134_vm0, %v5135_v6 }
  0x27   :  { %4544 = vmatprep.subr.bf16.mxu1 %v5133_v0 }
  0x28   :  { %4522 = vmatpush3.bf16.msra.mxu0 %v5364_v61 }
  0x29   :  { %4523 = vmatprep.subr.bf16.mxu0 %v5133_v0 }
  0x2a   :  { %4546 = vmatpush3.bf16.msra.mxu1 %v5191_v8 }
  0x2b   :  { %4547 = vmatprep.subr.bf16.mxu1 %v5133_v0 }
  0x2c   :  { %4525 = vmatpush3.bf16.msra.mxu0 %v5381_v1 }
  0x2d   :  { %4526 = vmatprep.subr.bf16.mxu0 %v5133_v0 }
  0x2e   :  { %4549 = vmatpush3.bf16.msra.mxu1 %v5218_v17 }
  0x2f   :  { %4550 = vmatprep.subr.bf16.mxu1 %v5133_v0 }
  0x30   :  { %4528 = vmatpush3.bf16.msra.mxu0 %v5393_v5 }
  0x31   :  { %4529 = vmatprep.subr.bf16.mxu0 %v5133_v0 }
  0x32   :  { %4552 = vmatpush3.bf16.msra.mxu1 %v5238_v23 }
  0x33   :  { %4553 = vmatprep.subr.bf16.mxu1 %v5133_v0 }
  0x34   :  { %4531 = vmatpush3.bf16.msra.mxu0 %v5405_v11 }
  0x35   :  { %4532 = vmatprep.subr.bf16.mxu0 %v5133_v0 }
  0x36   :  { %4555 = vmatpush3.bf16.msra.mxu1 %v5258_v29 }
  0x37   :  { %4556 = vmatprep.subr.bf16.mxu1 %v5133_v0 }
  0x38   :  { %4534 = vmatpush3.bf16.msra.mxu0 %v5417_v15 }
  0x39   :  { %4535 = vmatprep.subr.bf16.mxu0 %v5133_v0 }
  0x3a   :  { %4558 = vmatpush3.bf16.msra.mxu1 %v5286_v37 }
  0x3b   :  { %4559 = vmatprep.subr.bf16.mxu1 %v5133_v0 }
  0x3c   :  { %4537 = vmatpush3.bf16.msra.mxu0 %v5429_v20 }
  0x3d   :  { %4538 = vmatprep.subr.bf16.mxu0 %v5133_v0 }
  0x3e   :  { %4561 = vmatpush3.bf16.msra.mxu1 %v5308_v44 }
  0x3f   :  { %4562 = vmatprep.subr.bf16.mxu1 %v5133_v0 }
  0x40   :  { %4540 = vmatpush3.bf16.msra.mxu0 %v5441_v25 }
  0x41   :  { %4565 = vmatprep.subr.bf16.mxu0 %v5133_v0 }
  0x42   :  { %4564 = vmatpush3.bf16.msra.mxu1 %v5330_v51 }
  0x43   :  { %3732 = vmatmul.mubr.f32.vlgmr.msra.gmra.mrb[2].mxu0 %v5135_v6  ;;  %4589 = vmatprep.subr.bf16.mxu1 %v5133_v0 }
  0x44   :  { %4567 = vmatpush3.bf16.msra.mxu0 %v5206_v13  ;;  %3801 = vmatprep.mubr.msk.f32.mxu0 %vm5134_vm0, %v5135_v6 }
  0x45   :  { %4568 = vmatprep.subr.bf16.mxu0 %v5133_v0 }
  0x48   :  { %4570 = vmatpush3.bf16.msra.mxu0 %v5215_v16 }
  0x49   :  { %4571 = vmatprep.subr.bf16.mxu0 %v5133_v0 }
  0x4c   :  { %4573 = vmatpush3.bf16.msra.mxu0 %v5235_v22 }
  0x4d   :  { %4574 = vmatprep.subr.bf16.mxu0 %v5133_v0 }
  0x50   :  { %4576 = vmatpush3.bf16.msra.mxu0 %v5255_v28 }
  0x51   :  { %4577 = vmatprep.subr.bf16.mxu0 %v5133_v0 }
  0x54   :  { %4579 = vmatpush3.bf16.msra.mxu0 %v5281_v35 }
  0x55   :  { %4580 = vmatprep.subr.bf16.mxu0 %v5133_v0 }
  0x58   :  { %4582 = vmatpush3.bf16.msra.mxu0 %v5304_v43 }
  0x59   :  { %4583 = vmatprep.subr.bf16.mxu0 %v5133_v0 }
  0x5c   :  { %4585 = vmatpush3.bf16.msra.mxu0 %v5326_v50 }
  0x5d   :  { %4586 = vmatprep.subr.bf16.mxu0 %v5133_v0 }
  0x60   :  { %4588 = vmatpush3.bf16.msra.mxu0 %v5348_v57 }
  0x61   :  { %4613 = vmatprep.subr.bf16.mxu0 %v5133_v0 }
  0x8a   :  { %v5485_v12 = vpop.permute.xlu0 %314 }
  0x8b   :  { %vm316_vm5 = vcmp.eq.s32.totalorder %v5485_v12, 1 }
  0xf6   :  { %v112_v27 = vpop.f32.mrb[0].mxu0 }
  0xf7   :  { %v290_v30 = vadd.f32 %v112_v27, %v27_v26  ;;  %v3663_v31 = vpop.f32.mrb[1].mxu0 }
  0xf8   :  { %v199_v33 = vpop.f32.mrb[0].mxu1 }
  0xf9   :  { %v2925_v32 = vmul.f32 -1.442695, %v290_v30  ;;  %v3698_v36 = vpop.f32.mrb[1].mxu1  ;;  %v297_v39 = vadd.f32 %v199_v33, %v28_v38 }
  0xfb   :  { %5052 = vpow2.f32 %v2925_v32  ;;  %v2926_v40 = vmul.f32 -1.442695, %v297_v39 }
  0xfd   :  { %5054 = vpow2.f32 %v2926_v40 }
 0x105   :  { %v5053_v41 = vpop.eup %5052 }
 0x106   :  { %v294_v42 = vadd.f32 1.0, %v5053_v41 }
 0x107   :  { %v5055_v45 = vpop.eup %5054 }
 0x108   :  { %5056 = vrcp.f32 %v294_v42  ;;  %v301_v46 = vadd.f32 1.0, %v5055_v45 }
 0x10a   :  { %5058 = vrcp.f32 %v301_v46 }
 0x112   :  { %v5057_v53 = vpop.eup %5056 }
 0x114   :  { %v5059_v59 = vpop.eup %5058 }
 0x115   :  { %v307_v2 = vsub.f32 1.0, %v5059_v59  ;;  %v309_v18 = vmul.f32 0.0, %v5059_v59 }
 0x116   :  { %v286_v48 = vpop.f32.mrb[2].mxu0 }
 0x117   :  { %v287_v49 = vadd.f32 %v5479_v47, %v286_v48  ;;  %v3733_v52 = vpop.f32.mrb[3].mxu0 }
 0x119   :  { %v304_v55 = vmul.f32 %v5057_v53, %v287_v49  ;;  %v2933_v53 = vld [vmem:[%s6578_s0 + $0x28] sm:$0xff] }
 0x11b   :  { %v305_v56 = vadd.f32 %v304_v55, %v29_v54 }
 0x11d   :  { %5060 = vtanh.f32 %v305_v56 }
 0x127   :  { %v5061_v10 = vpop.eup %5060 }
 0x128   :  { %v308_v14 = vmul.f32 %v5061_v10, %v307_v2  ;;  %v671_v2 = vpop.permute.xlu0 %670 }
 0x129   :  { %vm672_vm10 = vcmp.eq.s32.totalorder %v671_v2, 1  ;;  %v1117_v2 = vld [vmem:[%s6576_s2 + $0x78] sm:$0xff] }
 0x12a   :  { %v310_v21 = vadd.f32 %v309_v18, %v308_v14 }
 0x12c   :  { %v5492_v24 = vsel %vm316_vm5, %v310_v21, 0.0  ;;  %3767 = vmatmul.mubr.msk.f32.vlgmr.msra.gmra.mrb[2].mxu1 %vm316_vm5, %v310_v21  ;;  %3802 = vmatmul.mubr.msk.f32.vlgmr.msra.gmra.mrb[4].mxu0 %vm316_vm5, %v310_v21 }
 0x12d   :  { %v319_v26 = vcombine.high %v5492_v24, %v5492_v24  ;;  %v326_v27 = vrot.slane %v5492_v24, %v5487_v19  ;;  %4591 = vmatpush3.bf16.msra.mxu1 %v5351_v58  ;;  %3836 = vmatprep.mubr.msk.f32.mxu1 %vm5134_vm0, %v5135_v6 }
 0x12e   :  { %4592 = vmatprep.subr.bf16.mxu1 %v5133_v0  ;;  %4615 = vmatpush3.bf16.msra.mxu0 %v5179_v4 }
 0x12f   :  { %v333_v30 = vrot.slane %v319_v26, %v5487_v19  ;;  %v334_v31 = vcombine.high %v326_v27, %v326_v27  ;;  %v342_v32 = vrot.slane %v326_v27, %v5487_v19  ;;  %2927 = vst.sshfl [vmem:[%s6580_s4] sm:$0x1 pattern:$0x73625140] %v326_v27  ;;  %4616 = vmatprep.subr.bf16.mxu0 %v5133_v0 }
 0x130   :  { %3871 = vmatprep.mubr.msk.f32.mxu0 %vm5134_vm0, %v5135_v6 }
 0x131   :  { %v335_v33 = vcombine.high %v333_v30, %v333_v30  ;;  %v349_v36 = vrot.slane %v333_v30, %v5487_v19  ;;  %v356_v38 = vrot.slane %v334_v31, %v5487_v19  ;;  %v364_v4 = vcombine.high %v342_v32, %v342_v32  ;;  %2928 = vst.sshfl [vmem:[%s6580_s4 + $0x8] sm:$0x1 pattern:$0x73625140] %v334_v31 }
 0x132   :  { %2929 = vst.sshfl [vmem:[%s6580_s4 + $0x20] sm:$0x1 pattern:$0x73625140] %v333_v30  ;;  %4594 = vmatpush3.bf16.msra.mxu1 %v5364_v61  ;;  %4618 = vmatpush3.bf16.msra.mxu0 %v5191_v8  ;;  %v1025_v8 = vsel %vm1024_vm6, 1, %v5136_v7 }
 0x133   :  { %4595 = vmatprep.subr.bf16.mxu1 %v5133_v0  ;;  %v363_v39 = vrot.slane %v335_v33, %v5487_v19  ;;  %v365_v40 = vcombine.high %v349_v36, %v349_v36  ;;  %v366_v41 = vcombine.high %v356_v38, %v356_v38  ;;  %378 = vst [vmem:[%s6580_s4 + $0x10] sm:$0x1] %v364_v4  ;;  %2930 = vst.sshfl [vmem:[%s6580_s4 + $0x28] sm:$0x1 pattern:$0x73625140] %v335_v33 }
 0x134   :  { %4619 = vmatprep.subr.bf16.mxu0 %v5133_v0  ;;  %1027 = vperm.xlu1 %5051, %v1025_v8   ;;  %v3021_v4 = vld [vmem:[%s6576_s2 + $0x90] sm:$0xff]  ;;  %v1107_v8 = vld [vmem:[%s6576_s2 + $0x28] sm:$0xff] }
 0x135   :  { %v367_v42 = vcombine.high %v363_v39, %v363_v39  ;;  %379 = vst [vmem:[%s6580_s4 + $0x18] sm:$0x1] %v366_v41  ;;  %382 = vst [vmem:[%s6580_s4 + $0x30] sm:$0x1] %v365_v40  ;;  %v3022_v39 = vld [vmem:[%s6576_s2 + $0x98] sm:$0xff] }
 0x136   :  { %4597 = vmatpush3.bf16.msra.mxu1 %v5381_v1  ;;  %4621 = vmatpush3.bf16.msra.mxu0 %v5218_v17  ;;  %v2810_v17 = vsel %vm2809_vm9, 1, %v5136_v7  ;;  %v5697_v41 = vpack.c.bf16 %v3022_v39, %v3021_v4  ;;  %v2977_v39 = vld [vmem:[%s6578_s0 + $0x40] sm:$0xff] }
 0x137   :  { %4598 = vmatprep.subr.bf16.mxu1 %v5133_v0  ;;  %383 = vst [vmem:[%s6580_s4 + $0x38] sm:$0x1] %v367_v42  ;;  %4622 = vmatprep.subr.bf16.mxu0 %v5133_v0  ;;  %v1106_v42 = vld [vmem:[%s6576_s2 + $0x20] sm:$0xff] }
 0x13a   :  { %4600 = vmatpush3.bf16.msra.mxu1 %v5393_v5  ;;  %4624 = vmatpush3.bf16.msra.mxu0 %v5238_v23 }
 0x13b   :  { %4601 = vmatprep.subr.bf16.mxu1 %v5133_v0  ;;  %4625 = vmatprep.subr.bf16.mxu0 %v5133_v0 }
 0x13e   :  { %4603 = vmatpush3.bf16.msra.mxu1 %v5405_v11  ;;  %4627 = vmatpush3.bf16.msra.mxu0 %v5258_v29 }
 0x13f   :  { %4604 = vmatprep.subr.bf16.mxu1 %v5133_v0  ;;  %4628 = vmatprep.subr.bf16.mxu0 %v5133_v0 }
 0x142   :  { %4606 = vmatpush3.bf16.msra.mxu1 %v5417_v15  ;;  %4630 = vmatpush3.bf16.msra.mxu0 %v5286_v37 }
 0x143   :  { %4607 = vmatprep.subr.bf16.mxu1 %v5133_v0  ;;  %4631 = vmatprep.subr.bf16.mxu0 %v5133_v0 }
 0x146   :  { %4609 = vmatpush3.bf16.msra.mxu1 %v5429_v20  ;;  %4633 = vmatpush3.bf16.msra.mxu0 %v5308_v44  ;;  %v2932_v44 = vld [vmem:[%s6578_s0 + $0x20] sm:$0xff] }
 0x147   :  { %4610 = vmatprep.subr.bf16.mxu1 %v5133_v0  ;;  %4634 = vmatprep.subr.bf16.mxu0 %v5133_v0 }
 0x14a   :  { %4612 = vmatpush3.bf16.msra.mxu1 %v5441_v25  ;;  %4636 = vmatpush3.bf16.msra.mxu0 %v5330_v51 }
 0x14b   :  { %4637 = vmatprep.subr.bf16.mxu1 %v5133_v0  ;;  %4661 = vmatprep.subr.bf16.mxu0 %v5133_v0 }
 0x14d   :  { %3837 = vmatmul.mubr.msk.f32.vlgmr.msra.gmra.mrb[4].mxu1 %vm316_vm5, %v310_v21 }
 0x14e   :  { %4639 = vmatpush3.bf16.msra.mxu1 %v5206_v13  ;;  %3906 = vmatprep.mubr.msk.f32.mxu1 %vm5134_vm0, %v5135_v6  ;;  %v1382_v13 = vsel %vm1381_vm7, 1, %v5136_v7 }
 0x14f   :  { %4640 = vmatprep.subr.bf16.mxu1 %v5133_v0  ;;  %1384 = vperm.xlu1 %5051, %v1382_v13   ;;  %v5707_v13 = vpack.c.bf16 %v1107_v8, %v1106_v42 }
 0x152   :  { %4642 = vmatpush3.bf16.msra.mxu1 %v5215_v16  ;;  %v2096_v16 = vsel %vm2095_vm8, 1, %v5136_v7 }
 0x153   :  { %4643 = vmatprep.subr.bf16.mxu1 %v5133_v0  ;;  %2098 = vperm.xlu1 %5051, %v2096_v16   ;;  %v3023_v16 = vld [vmem:[%s6576_s2 + $0xa0] sm:$0xff] }
 0x156   :  { %4645 = vmatpush3.bf16.msra.mxu1 %v5235_v22  ;;  %v2931_v22 = vld [vmem:[%s6578_s0 + $0x18] sm:$0xff] }
 0x157   :  { %4646 = vmatprep.subr.bf16.mxu1 %v5133_v0  ;;  %2812 = vperm.xlu1 %5051, %v2810_v17   ;;  %v3024_v17 = vld [vmem:[%s6576_s2 + $0xa8] sm:$0xff] }
 0x15a   :  { %4648 = vmatpush3.bf16.msra.mxu1 %v5255_v28 }
 0x15b   :  { %4649 = vmatprep.subr.bf16.mxu1 %v5133_v0 }
 0x15e   :  { %4651 = vmatpush3.bf16.msra.mxu1 %v5281_v35 }
 0x15f   :  { %4652 = vmatprep.subr.bf16.mxu1 %v5133_v0 }
 0x162   :  { %4654 = vmatpush3.bf16.msra.mxu1 %v5304_v43 }
 0x163   :  { %4655 = vmatprep.subr.bf16.mxu1 %v5133_v0 }
 0x166   :  { %4657 = vmatpush3.bf16.msra.mxu1 %v5326_v50 }
 0x167   :  { %4658 = vmatprep.subr.bf16.mxu1 %v5133_v0 }
 0x16a   :  { %4660 = vmatpush3.bf16.msra.mxu1 %v5348_v57 }
 0x16b   :  { %4685 = vmatprep.subr.bf16.mxu1 %v5133_v0 }
 0x1ff   :  { %v470_v23 = vpop.f32.mrb[2].mxu1  ;;  %v556_v28 = vpop.f32.mrb[4].mxu0 }
 0x200   :  { %v646_v29 = vadd.f32 %v2931_v22, %v470_v23  ;;  %v3768_v35 = vpop.f32.mrb[3].mxu1  ;;  %v3803_v37 = vpop.f32.mrb[5].mxu0  ;;  %v653_v34 = vadd.f32 %v2932_v44, %v556_v28  ;;  %v5719_v22 = vpack.c.bf16 %v3024_v17, %v3023_v16  ;;  %v1108_v23 = vld [vmem:[%s6576_s2 + $0x30] sm:$0xff]  ;;  %v1109_v28 = vld [vmem:[%s6576_s2 + $0x38] sm:$0xff]  ;;  %v1110_v44 = vld [vmem:[%s6576_s2 + $0x40] sm:$0xff] }
 0x201   :  { %v3025_v35 = vld [vmem:[%s6576_s2 + $0xb0] sm:$0xff]  ;;  %v3026_v37 = vld [vmem:[%s6576_s2 + $0xb8] sm:$0xff] }
 0x202   :  { %v2969_v43 = vmul.f32 -1.442695, %v646_v29  ;;  %v2970_v50 = vmul.f32 -1.442695, %v653_v34  ;;  %v5729_v29 = vpack.c.bf16 %v1109_v28, %v1108_v23  ;;  %v1111_v34 = vld [vmem:[%s6576_s2 + $0x48] sm:$0xff]  ;;  %v3035_v28 = vld [vmem:[%s6576_s2 + $0x100] sm:$0xff] }
 0x204   :  { %5062 = vpow2.f32 %v2969_v43  ;;  %v5738_v43 = vpack.c.bf16 %v3026_v37, %v3025_v35  ;;  %v3036_v35 = vld [vmem:[%s6576_s2 + $0x108] sm:$0xff]  ;;  %v1028_v37 = vpop.permute.xlu1 %1027 }
 0x205   :  { %5064 = vpow2.f32 %v2970_v50  ;;  %v5749_v50 = vpack.c.bf16 %v1111_v34, %v1110_v44  ;;  %vm1029_vm11 = vcmp.eq.s32.totalorder %v1028_v37, 1 }
 0x20e   :  { %v5063_v51 = vpop.eup %5062 }
 0x20f   :  { %v650_v7 = vadd.f32 1.0, %v5063_v51  ;;  %v5065_v57 = vpop.eup %5064  ;;  %v3027_v51 = vld [vmem:[%s6576_s2 + $0xc0] sm:$0xff] }
 0x210   :  { %v657_v45 = vadd.f32 1.0, %v5065_v57 }
 0x211   :  { %5066 = vrcp.f32 %v650_v7  ;;  %v3028_v7 = vld [vmem:[%s6576_s2 + $0xc8] sm:$0xff] }
 0x212   :  { %5068 = vrcp.f32 %v657_v45  ;;  %v5758_v57 = vpack.c.bf16 %v3028_v7, %v3027_v51  ;;  %v1112_v45 = vld [vmem:[%s6576_s2 + $0x50] sm:$0xff]  ;;  %v5841_v7 = vpack.c.bf16 %v3036_v35, %v3035_v28 }
 0x21b   :  { %v5067_v52 = vpop.eup %5066 }
 0x21c   :  { %v5069_v56 = vpop.eup %5068 }
 0x21d   :  { %v663_v59 = vsub.f32 1.0, %v5069_v56  ;;  %v665_v63 = vmul.f32 %v5069_v56, %v5492_v24 }
 0x220   :  { %v642_v46 = vpop.f32.mrb[4].mxu1 }
 0x221   :  { %v643_v48 = vadd.f32 %v5479_v47, %v642_v46  ;;  %v3838_v49 = vpop.f32.mrb[5].mxu1  ;;  %v1113_v46 = vld [vmem:[%s6576_s2 + $0x58] sm:$0xff] }
 0x222   :  { %v3029_v49 = vld [vmem:[%s6576_s2 + $0xd0] sm:$0xff] }
 0x223   :  { %v660_v54 = vmul.f32 %v5067_v52, %v643_v48  ;;  %v5769_v48 = vpack.c.bf16 %v1113_v46, %v1112_v45  ;;  %v3030_v52 = vld [vmem:[%s6576_s2 + $0xd8] sm:$0xff]  ;;  %v3037_v45 = vld [vmem:[%s6576_s2 + $0x110] sm:$0xff] }
 0x224   :  { %v3038_v46 = vld [vmem:[%s6576_s2 + $0x118] sm:$0xff] }
 0x225   :  { %v661_v55 = vadd.f32 %v2933_v53, %v660_v54  ;;  %v5778_v53 = vpack.c.bf16 %v3030_v52, %v3029_v49  ;;  %v1114_v54 = vld [vmem:[%s6576_s2 + $0x60] sm:$0xff] }
 0x227   :  { %5070 = vtanh.f32 %v661_v55  ;;  %v1115_v55 = vld [vmem:[%s6576_s2 + $0x68] sm:$0xff] }
 0x228   :  { %v5789_v56 = vpack.c.bf16 %v1115_v55, %v1114_v54 }
 0x231   :  { %v5071_v60 = vpop.eup %5070 }
 0x232   :  { %v664_v62 = vmul.f32 %v5071_v60, %v663_v59  ;;  %v3031_v59 = vld [vmem:[%s6576_s2 + $0xe0] sm:$0xff]  ;;  %v3032_v60 = vld [vmem:[%s6576_s2 + $0xe8] sm:$0xff] }
 0x234   :  { %v666_v3 = vadd.f32 %v665_v63, %v664_v62  ;;  %v5798_v62 = vpack.c.bf16 %v3032_v60, %v3031_v59  ;;  %v1116_v63 = vld [vmem:[%s6576_s2 + $0x70] sm:$0xff]  ;;  %v5856_v59 = vpack.c.bf16 %v3038_v46, %v3037_v45 }
 0x235   :  { %v3017_v45 = vld [vmem:[%s6578_s0 + $0x50] sm:$0xff] }
 0x236   :  { %v5607_v9 = vsel %vm672_vm10, %v666_v3, %v5492_v24  ;;  %v674_v10 = vsel %vm672_vm10, %v666_v3, 0.0  ;;  %v5809_v3 = vpack.c.bf16 %v1117_v2, %v1116_v63  ;;  %v3039_v2 = vld [vmem:[%s6576_s2 + $0x120] sm:$0xff] }
 0x237   :  { %v676_v12 = vcombine.high %v674_v10, %v674_v10  ;;  %v683_v14 = vrot.slane %v674_v10, %v5487_v19  ;;  %3872 = vmatmul.mubr.f32.vlgmr.msra.gmra.mrb[6].mxu0 %v5607_v9  ;;  %3907 = vmatmul.mubr.f32.vlgmr.msra.gmra.mrb[6].mxu1 %v5607_v9  ;;  %v3033_v10 = vld [vmem:[%s6576_s2 + $0xf0] sm:$0xff] }
 0x238   :  { %4663 = vmatpush3.bf16.msra.mxu0 %v5351_v58  ;;  %3941 = vmatprep.mubr.msk.f32.mxu0 %vm5134_vm0, %v5135_v6 }
 0x239   :  { %v690_v18 = vrot.slane %v676_v12, %v5487_v19  ;;  %v691_v21 = vcombine.high %v683_v14, %v683_v14  ;;  %v699_v26 = vrot.slane %v683_v14, %v5487_v19  ;;  %2971 = vst.sshfl [vmem:[%s6580_s4 + $0x1] sm:$0x1 pattern:$0x73625140] %v683_v14  ;;  %4664 = vmatprep.subr.bf16.mxu0 %v5133_v0  ;;  %v3034_v12 = vld [vmem:[%s6576_s2 + $0xf8] sm:$0xff] }
 0x23a   :  { %3976 = vmatprep.mubr.msk.f32.mxu1 %vm5134_vm0, %v5135_v6  ;;  %v5818_v14 = vpack.c.bf16 %v3034_v12, %v3033_v10  ;;  %v3040_v10 = vld [vmem:[%s6576_s2 + $0x128] sm:$0xff] }
 0x23b   :  { %v692_v24 = vcombine.high %v690_v18, %v690_v18  ;;  %v706_v58 = vrot.slane %v690_v18, %v5487_v19  ;;  %v713_v27 = vrot.slane %v691_v21, %v5487_v19  ;;  %v721_v30 = vcombine.high %v699_v26, %v699_v26  ;;  %2972 = vst.sshfl [vmem:[%s6580_s4 + $0x9] sm:$0x1 pattern:$0x73625140] %v691_v21 }
 0x23c   :  { %2973 = vst.sshfl [vmem:[%s6580_s4 + $0x21] sm:$0x1 pattern:$0x73625140] %v690_v18  ;;  %4666 = vmatpush3.bf16.msra.mxu0 %v5364_v61  ;;  %v1102_v61 = vld [vmem:[%s6576_s2] sm:$0xff]  ;;  %v2975_v18 = vld [vmem:[%s6578_s0 + $0x30] sm:$0xff] }
 0x23d   :  { %v720_v31 = vrot.slane %v692_v24, %v5487_v19  ;;  %v722_v32 = vcombine.high %v706_v58, %v706_v58  ;;  %v723_v33 = vcombine.high %v713_v27, %v713_v27  ;;  %735 = vst [vmem:[%s6580_s4 + $0x11] sm:$0x1] %v721_v30  ;;  %2974 = vst.sshfl [vmem:[%s6580_s4 + $0x29] sm:$0x1 pattern:$0x73625140] %v692_v24  ;;  %4667 = vmatprep.subr.bf16.mxu0 %v5133_v0 }
 0x23f   :  { %v724_v36 = vcombine.high %v720_v31, %v720_v31  ;;  %736 = vst [vmem:[%s6580_s4 + $0x19] sm:$0x1] %v723_v33  ;;  %739 = vst [vmem:[%s6580_s4 + $0x31] sm:$0x1] %v722_v32  ;;  %v2976_v31 = vld [vmem:[%s6578_s0 + $0x38] sm:$0xff] }
 0x240   :  { %4669 = vmatpush3.bf16.msra.mxu0 %v5381_v1  ;;  %v1103_v1 = vld [vmem:[%s6576_s2 + $0x8] sm:$0xff] }
 0x241   :  { %740 = vst [vmem:[%s6580_s4 + $0x39] sm:$0x1] %v724_v36  ;;  %4670 = vmatprep.subr.bf16.mxu0 %v5133_v0 }
 0x244   :  { %4672 = vmatpush3.bf16.msra.mxu0 %v5393_v5  ;;  %v3019_v5 = vld [vmem:[%s6576_s2 + $0x80] sm:$0xff] }
 0x245   :  { %4673 = vmatprep.subr.bf16.mxu0 %v5133_v0 }
 0x248   :  { %4675 = vmatpush3.bf16.msra.mxu0 %v5405_v11  ;;  %v5673_v11 = vpack.c.bf16 %v1103_v1, %v1102_v61 }
 0x249   :  { %4676 = vmatprep.subr.bf16.mxu0 %v5133_v0 }
 0x24a   :  { %4687 = vmatpush3.bf16.msra.mxu1 %v5673_v11 }
 0x24b   :  { %4688 = vmatprep.subr.bf16.mxu1 %v5133_v0 }
 0x24c   :  { %4678 = vmatpush3.bf16.msra.mxu0 %v5417_v15  ;;  %v3020_v15 = vld [vmem:[%s6576_s2 + $0x88] sm:$0xff] }
 0x24d   :  { %4679 = vmatprep.subr.bf16.mxu0 %v5133_v0  ;;  %v5684_v38 = vpack.c.bf16 %v3020_v15, %v3019_v5 }
 0x250   :  { %4681 = vmatpush3.bf16.msra.mxu0 %v5429_v20  ;;  %v1104_v20 = vld [vmem:[%s6576_s2 + $0x10] sm:$0xff] }
 0x251   :  { %4682 = vmatprep.subr.bf16.mxu0 %v5133_v0 }
 0x254   :  { %4684 = vmatpush3.bf16.msra.mxu0 %v5441_v25  ;;  %v1105_v25 = vld [vmem:[%s6576_s2 + $0x18] sm:$0xff] }
 0x255   :  { %4709 = vmatprep.subr.bf16.mxu0 %v5133_v0  ;;  %v5693_v40 = vpack.c.bf16 %v1105_v25, %v1104_v20 }
 0x257   :  { %3942 = vmatmul.mubr.f32.vlgmr.msra.gmra.mrb[8].mxu0 %v5607_v9  ;;  %4690 = vmatpush3.bf16.msra.mxu1 %v5693_v40 }
 0x258   :  { %4011 = vmatprep.mubr.msk.f32.mxu0 %vm5134_vm0, %v5135_v6  ;;  %4711 = vmatpush3.bf16.msra.mxu0 %v5684_v38 }
 0x259   :  { %4712 = vmatprep.subr.bf16.mxu0 %v5133_v0  ;;  %4691 = vmatprep.subr.bf16.mxu1 %v5133_v0 }
 0x25b   :  { %4693 = vmatpush3.bf16.msra.mxu1 %v5707_v13 }
 0x25c   :  { %4714 = vmatpush3.bf16.msra.mxu0 %v5697_v41  ;;  %4694 = vmatprep.subr.bf16.mxu1 %v5133_v0 }
 0x25d   :  { %4715 = vmatprep.subr.bf16.mxu0 %v5133_v0 }
 0x25f   :  { %4696 = vmatpush3.bf16.msra.mxu1 %v5729_v29 }
 0x260   :  { %4717 = vmatpush3.bf16.msra.mxu0 %v5719_v22  ;;  %4697 = vmatprep.subr.bf16.mxu1 %v5133_v0 }
 0x261   :  { %4718 = vmatprep.subr.bf16.mxu0 %v5133_v0 }
 0x263   :  { %4699 = vmatpush3.bf16.msra.mxu1 %v5749_v50 }
 0x264   :  { %4720 = vmatpush3.bf16.msra.mxu0 %v5738_v43  ;;  %4700 = vmatprep.subr.bf16.mxu1 %v5133_v0 }
 0x265   :  { %4721 = vmatprep.subr.bf16.mxu0 %v5133_v0 }
 0x267   :  { %4702 = vmatpush3.bf16.msra.mxu1 %v5769_v48 }
 0x268   :  { %4723 = vmatpush3.bf16.msra.mxu0 %v5758_v57  ;;  %4703 = vmatprep.subr.bf16.mxu1 %v5133_v0 }
 0x269   :  { %4724 = vmatprep.subr.bf16.mxu0 %v5133_v0 }
 0x26b   :  { %4705 = vmatpush3.bf16.msra.mxu1 %v5789_v56 }
 0x26c   :  { %4726 = vmatpush3.bf16.msra.mxu0 %v5778_v53  ;;  %4706 = vmatprep.subr.bf16.mxu1 %v5133_v0 }
 0x26d   :  { %4727 = vmatprep.subr.bf16.mxu0 %v5133_v0 }
 0x26f   :  { %4708 = vmatpush3.bf16.msra.mxu1 %v5809_v3 }
 0x270   :  { %4729 = vmatpush3.bf16.msra.mxu0 %v5798_v62  ;;  %4733 = vmatprep.subr.bf16.mxu1 %v5133_v0 }
 0x271   :  { %4730 = vmatprep.subr.bf16.mxu0 %v5133_v0 }
 0x274   :  { %4732 = vmatpush3.bf16.msra.mxu0 %v5818_v14 }
 0x275   :  { %4757 = vmatprep.subr.bf16.mxu0 %v5133_v0 }
 0x30a   :  { %v827_v21 = vpop.f32.mrb[6].mxu0  ;;  %v913_v26 = vpop.f32.mrb[6].mxu1 }
 0x30b   :  { %v1003_v24 = vadd.f32 %v2975_v18, %v827_v21  ;;  %v3873_v58 = vpop.f32.mrb[7].mxu0  ;;  %v3908_v27 = vpop.f32.mrb[7].mxu1  ;;  %v1010_v32 = vadd.f32 %v2976_v31, %v913_v26  ;;  %v3041_v31 = vld [vmem:[%s6576_s2 + $0x130] sm:$0xff] }
 0x30d   :  { %v3010_v30 = vmul.f32 -1.442695, %v1003_v24  ;;  %v3011_v33 = vmul.f32 -1.442695, %v1010_v32  ;;  %v5885_v24 = vpack.c.bf16 %v3040_v10, %v3039_v2  ;;  %v3042_v32 = vld [vmem:[%s6576_s2 + $0x138] sm:$0xff] }
 0x30f   :  { %5072 = vpow2.f32 %v3010_v30 }
 0x310   :  { %5074 = vpow2.f32 %v3011_v33 }
 0x319   :  { %v5073_v36 = vpop.eup %5072 }
 0x31a   :  { %v1007_v61 = vadd.f32 1.0, %v5073_v36  ;;  %v5075_v1 = vpop.eup %5074  ;;  %v5910_v36 = vpack.c.bf16 %v3042_v32, %v3041_v31 }
 0x31b   :  { %v1014_v5 = vadd.f32 1.0, %v5075_v1  ;;  %v3044_v1 = vld [vmem:[%s6576_s2 + $0x148] sm:$0xff] }
 0x31c   :  { %5076 = vrcp.f32 %v1007_v61  ;;  %v3043_v61 = vld [vmem:[%s6576_s2 + $0x140] sm:$0xff] }
 0x31d   :  { %5078 = vrcp.f32 %v1014_v5  ;;  %v5925_v5 = vpack.c.bf16 %v3044_v1, %v3043_v61 }
 0x326   :  { %v5077_v4 = vpop.eup %5076 }
 0x327   :  { %v5079_v16 = vpop.eup %5078 }
 0x328   :  { %v1020_v17 = vsub.f32 1.0, %v5079_v16  ;;  %v1022_v34 = vmul.f32 %v5079_v16, %v5607_v9  ;;  %v3050_v16 = vld [vmem:[%s6576_s2 + $0x178] sm:$0xff] }
 0x32a   :  { %v999_v15 = vpop.f32.mrb[8].mxu0 }
 0x32b   :  { %v1000_v20 = vadd.f32 %v5479_v47, %v999_v15  ;;  %v3943_v25 = vpop.f32.mrb[9].mxu0  ;;  %v3045_v15 = vld [vmem:[%s6576_s2 + $0x150] sm:$0xff] }
 0x32d   :  { %v1017_v42 = vmul.f32 %v5077_v4, %v1000_v20  ;;  %v3046_v20 = vld [vmem:[%s6576_s2 + $0x158] sm:$0xff]  ;;  %v3047_v4 = vld [vmem:[%s6576_s2 + $0x160] sm:$0xff] }
 0x32e   :  { %v5937_v25 = vpack.c.bf16 %v3046_v20, %v3045_v15 }
 0x32f   :  { %v1018_v8 = vadd.f32 %v2977_v39, %v1017_v42  ;;  %v3048_v39 = vld [vmem:[%s6576_s2 + $0x168] sm:$0xff] }
 0x330   :  { %v5949_v42 = vpack.c.bf16 %v3048_v39, %v3047_v4 }
 0x331   :  { %5080 = vtanh.f32 %v1018_v8  ;;  %v3049_v8 = vld [vmem:[%s6576_s2 + $0x170] sm:$0xff] }
 0x33b   :  { %v5081_v23 = vpop.eup %5080 }
 0x33c   :  { %v1021_v44 = vmul.f32 %v5081_v23, %v1020_v17  ;;  %v5961_v17 = vpack.c.bf16 %v3050_v16, %v3049_v8  ;;  %v3016_v23 = vld [vmem:[%s6578_s0 + $0x48] sm:$0xff] }
 0x33e   :  { %v1023_v51 = vadd.f32 %v1022_v34, %v1021_v44 }
 0x340   :  { %v5850_v49 = vsel %vm1029_vm11, %v1023_v51, %v5607_v9  ;;  %v1031_v52 = vsel %vm1029_vm11, %v1023_v51, 0.0 }
 0x341   :  { %v1033_v54 = vcombine.high %v1031_v52, %v1031_v52  ;;  %v1040_v55 = vrot.slane %v1031_v52, %v5487_v19  ;;  %3977 = vmatmul.mubr.f32.vlgmr.msra.gmra.mrb[8].mxu1 %v5850_v49  ;;  %4012 = vmatmul.mubr.f32.vlgmr.msra.gmra.mrb[10].mxu0 %v5850_v49 }
 0x342   :  { %4735 = vmatpush3.bf16.msra.mxu1 %v5841_v7  ;;  %4046 = vmatprep.mubr.msk.f32.mxu1 %vm5134_vm0, %v5135_v6 }
 0x343   :  { %v1047_v60 = vrot.slane %v1033_v54, %v5487_v19  ;;  %v1048_v63 = vcombine.high %v1040_v55, %v1040_v55  ;;  %v1056_v9 = vrot.slane %v1040_v55, %v5487_v19  ;;  %3012 = vst.sshfl [vmem:[%s6580_s4 + $0x2] sm:$0x1 pattern:$0x73625140] %v1040_v55  ;;  %4736 = vmatprep.subr.bf16.mxu1 %v5133_v0 }
 0x344   :  { %4759 = vmatpush3.bf16.msra.mxu0 %v5673_v11  ;;  %4081 = vmatprep.mubr.msk.f32.mxu0 %vm5134_vm0, %v5135_v6 }
 0x345   :  { %4760 = vmatprep.subr.bf16.mxu0 %v5133_v0  ;;  %v1049_v12 = vcombine.high %v1047_v60, %v1047_v60  ;;  %v1063_v18 = vrot.slane %v1047_v60, %v5487_v19  ;;  %v1070_v21 = vrot.slane %v1048_v63, %v5487_v19  ;;  %v1078_v26 = vcombine.high %v1056_v9, %v1056_v9 }
 0x346   :  { %3013 = vst.sshfl [vmem:[%s6580_s4 + $0xa] sm:$0x1 pattern:$0x73625140] %v1048_v63  ;;  %4738 = vmatpush3.bf16.msra.mxu1 %v5856_v59 }
 0x347   :  { %3014 = vst.sshfl [vmem:[%s6580_s4 + $0x22] sm:$0x1 pattern:$0x73625140] %v1047_v60  ;;  %v1077_v58 = vrot.slane %v1049_v12, %v5487_v19  ;;  %v1079_v27 = vcombine.high %v1063_v18, %v1063_v18  ;;  %v1080_v30 = vcombine.high %v1070_v21, %v1070_v21  ;;  %1092 = vst [vmem:[%s6580_s4 + $0x12] sm:$0x1] %v1078_v26  ;;  %4739 = vmatprep.subr.bf16.mxu1 %v5133_v0 }
 0x348   :  { %3015 = vst.sshfl [vmem:[%s6580_s4 + $0x2a] sm:$0x1 pattern:$0x73625140] %v1049_v12  ;;  %4762 = vmatpush3.bf16.msra.mxu0 %v5693_v40  ;;  %v3018_v18 = vld [vmem:[%s6578_s0 + $0x58] sm:$0xff] }
 0x349   :  { %4763 = vmatprep.subr.bf16.mxu0 %v5133_v0  ;;  %v1081_v33 = vcombine.high %v1077_v58, %v1077_v58  ;;  %1093 = vst [vmem:[%s6580_s4 + $0x1a] sm:$0x1] %v1080_v30  ;;  %1096 = vst [vmem:[%s6580_s4 + $0x32] sm:$0x1] %v1079_v27 }
 0x34a   :  { %4741 = vmatpush3.bf16.msra.mxu1 %v5885_v24 }
 0x34b   :  { %1097 = vst [vmem:[%s6580_s4 + $0x3a] sm:$0x1] %v1081_v33  ;;  %4742 = vmatprep.subr.bf16.mxu1 %v5133_v0  ;;  %v1385_v33 = vpop.permute.xlu1 %1384 }
 0x34c   :  { %4765 = vmatpush3.bf16.msra.mxu0 %v5707_v13  ;;  %vm1386_vm12 = vcmp.eq.s32.totalorder %v1385_v33, 1 }
 0x34d   :  { %4766 = vmatprep.subr.bf16.mxu0 %v5133_v0 }
 0x34e   :  { %4744 = vmatpush3.bf16.msra.mxu1 %v5910_v36 }
 0x34f   :  { %4745 = vmatprep.subr.bf16.mxu1 %v5133_v0 }
 0x350   :  { %4768 = vmatpush3.bf16.msra.mxu0 %v5729_v29 }
 0x351   :  { %4769 = vmatprep.subr.bf16.mxu0 %v5133_v0 }
 0x352   :  { %4747 = vmatpush3.bf16.msra.mxu1 %v5925_v5 }
 0x353   :  { %4748 = vmatprep.subr.bf16.mxu1 %v5133_v0 }
 0x354   :  { %4771 = vmatpush3.bf16.msra.mxu0 %v5749_v50 }
 0x355   :  { %4772 = vmatprep.subr.bf16.mxu0 %v5133_v0 }
 0x356   :  { %4750 = vmatpush3.bf16.msra.mxu1 %v5937_v25 }
 0x357   :  { %4751 = vmatprep.subr.bf16.mxu1 %v5133_v0 }
 0x358   :  { %4774 = vmatpush3.bf16.msra.mxu0 %v5769_v48 }
 0x359   :  { %4775 = vmatprep.subr.bf16.mxu0 %v5133_v0 }
 0x35a   :  { %4753 = vmatpush3.bf16.msra.mxu1 %v5949_v42 }
 0x35b   :  { %4754 = vmatprep.subr.bf16.mxu1 %v5133_v0 }
 0x35c   :  { %4777 = vmatpush3.bf16.msra.mxu0 %v5789_v56 }
 0x35d   :  { %4778 = vmatprep.subr.bf16.mxu0 %v5133_v0 }
 0x35e   :  { %4756 = vmatpush3.bf16.msra.mxu1 %v5961_v17 }
 0x35f   :  { %4781 = vmatprep.subr.bf16.mxu1 %v5133_v0 }
 0x360   :  { %4780 = vmatpush3.bf16.msra.mxu0 %v5809_v3 }
 0x361   :  { %4805 = vmatprep.subr.bf16.mxu0 %v5133_v0  ;;  %4047 = vmatmul.mubr.f32.vlgmr.msra.gmra.mrb[10].mxu1 %v5850_v49 }
 0x362   :  { %4783 = vmatpush3.bf16.msra.mxu1 %v5684_v38  ;;  %4116 = vmatprep.mubr.msk.f32.mxu1 %vm5134_vm0, %v5135_v6 }
 0x363   :  { %4784 = vmatprep.subr.bf16.mxu1 %v5133_v0 }
 0x366   :  { %4786 = vmatpush3.bf16.msra.mxu1 %v5697_v41 }
 0x367   :  { %4787 = vmatprep.subr.bf16.mxu1 %v5133_v0 }
 0x36a   :  { %4789 = vmatpush3.bf16.msra.mxu1 %v5719_v22 }
 0x36b   :  { %4790 = vmatprep.subr.bf16.mxu1 %v5133_v0 }
 0x36e   :  { %4792 = vmatpush3.bf16.msra.mxu1 %v5738_v43 }
 0x36f   :  { %4793 = vmatprep.subr.bf16.mxu1 %v5133_v0 }
 0x372   :  { %4795 = vmatpush3.bf16.msra.mxu1 %v5758_v57 }
 0x373   :  { %4796 = vmatprep.subr.bf16.mxu1 %v5133_v0 }
 0x376   :  { %4798 = vmatpush3.bf16.msra.mxu1 %v5778_v53 }
 0x377   :  { %4799 = vmatprep.subr.bf16.mxu1 %v5133_v0 }
 0x37a   :  { %4801 = vmatpush3.bf16.msra.mxu1 %v5798_v62 }
 0x37b   :  { %4802 = vmatprep.subr.bf16.mxu1 %v5133_v0 }
 0x37e   :  { %4804 = vmatpush3.bf16.msra.mxu1 %v5818_v14 }
 0x37f   :  { %4829 = vmatprep.subr.bf16.mxu1 %v5133_v0 }
 0x414   :  { %v1184_v28 = vpop.f32.mrb[8].mxu1  ;;  %v1270_v35 = vpop.f32.mrb[10].mxu0 }
 0x415   :  { %v1360_v37 = vadd.f32 %v3016_v23, %v1184_v28  ;;  %v3978_v44 = vpop.f32.mrb[9].mxu1  ;;  %v4013_v34 = vpop.f32.mrb[11].mxu0  ;;  %v1367_v46 = vadd.f32 %v3017_v45, %v1270_v35 }
 0x417   :  { %v3051_v51 = vmul.f32 -1.442695, %v1360_v37  ;;  %v3052_v52 = vmul.f32 -1.442695, %v1367_v46 }
 0x419   :  { %5082 = vpow2.f32 %v3051_v51 }
 0x41a   :  { %5084 = vpow2.f32 %v3052_v52 }
 0x423   :  { %v5083_v54 = vpop.eup %5082 }
 0x424   :  { %v1364_v55 = vadd.f32 1.0, %v5083_v54  ;;  %v5085_v60 = vpop.eup %5084 }
 0x425   :  { %v1371_v63 = vadd.f32 1.0, %v5085_v60  ;;  %v6099_v60 = vld [vmem:[%s6579_s3] ss:$0 sm:$0xff] }
 0x426   :  { %5086 = vrcp.f32 %v1364_v55 }
 0x427   :  { %5088 = vrcp.f32 %v1371_v63 }
 0x430   :  { %v5087_v12 = vpop.eup %5086 }
 0x431   :  { %v5089_v58 = vpop.eup %5088 }
 0x432   :  { %v1377_v27 = vsub.f32 1.0, %v5089_v58  ;;  %v1379_v32 = vmul.f32 %v5089_v58, %v5850_v49 }
 0x434   :  { %v1356_v9 = vpop.f32.mrb[10].mxu1 }
 0x435   :  { %v1357_v2 = vadd.f32 %v5479_v47, %v1356_v9  ;;  %v4048_v10 = vpop.f32.mrb[11].mxu1 }
 0x436   :  { %v3059_v10 = vld [vmem:[%s6578_s0 + $0x70] sm:$0xff] }
 0x437   :  { %v1374_v21 = vmul.f32 %v5087_v12, %v1357_v2 }
 0x439   :  { %v1375_v26 = vadd.f32 %v3018_v18, %v1374_v21 }
 0x43b   :  { %5090 = vtanh.f32 %v1375_v26 }
 0x445   :  { %v5091_v30 = vpop.eup %5090 }
 0x446   :  { %v1378_v31 = vmul.f32 %v5091_v30, %v1377_v27 }
 0x448   :  { %v1380_v61 = vadd.f32 %v1379_v32, %v1378_v31  ;;  %v1742_v31 = vpop.permute.xlu0 %1741 }
 0x449   :  { %vm1743_vm13 = vcmp.eq.s32.totalorder %v1742_v31, 1 }
 0x44a   :  { %v6001_v47 = vsel %vm1386_vm12, %v1380_v61, %v5850_v49  ;;  %v1388_v1 = vsel %vm1386_vm12, %v1380_v61, 0.0 }
 0x44b   :  { %v1390_v15 = vcombine.high %v1388_v1, %v1388_v1  ;;  %v1397_v20 = vrot.slane %v1388_v1, %v5487_v19  ;;  %4082 = vmatmul.mubr.f32.vlgmr.msra.gmra.mrb[12].mxu0 %v6001_v47  ;;  %4117 = vmatmul.mubr.f32.vlgmr.msra.gmra.mrb[12].mxu1 %v6001_v47 }
 0x44c   :  { %4807 = vmatpush3.bf16.msra.mxu0 %v5841_v7  ;;  %4151 = vmatprep.mubr.msk.f32.mxu0 %vm5134_vm0, %v5135_v6 }
 0x44d   :  { %v1404_v4 = vrot.slane %v1390_v15, %v5487_v19  ;;  %v1405_v39 = vcombine.high %v1397_v20, %v1397_v20  ;;  %v1413_v8 = vrot.slane %v1397_v20, %v5487_v19  ;;  %3053 = vst.sshfl [vmem:[%s6580_s4 + $0x3] sm:$0x1 pattern:$0x73625140] %v1397_v20  ;;  %4808 = vmatprep.subr.bf16.mxu0 %v5133_v0 }
 0x44e   :  { %4831 = vmatpush3.bf16.msra.mxu1 %v5673_v11  ;;  %4186 = vmatprep.mubr.msk.f32.mxu1 %vm5134_vm0, %v5135_v6 }
 0x44f   :  { %4832 = vmatprep.subr.bf16.mxu1 %v5133_v0  ;;  %v1406_v49 = vcombine.high %v1404_v4, %v1404_v4  ;;  %v1420_v16 = vrot.slane %v1404_v4, %v5487_v19  ;;  %v1427_v23 = vrot.slane %v1405_v39, %v5487_v19  ;;  %v1435_v28 = vcombine.high %v1413_v8, %v1413_v8 }
 0x450   :  { %3054 = vst.sshfl [vmem:[%s6580_s4 + $0xb] sm:$0x1 pattern:$0x73625140] %v1405_v39  ;;  %4810 = vmatpush3.bf16.msra.mxu0 %v5856_v59 }
 0x451   :  { %3055 = vst.sshfl [vmem:[%s6580_s4 + $0x23] sm:$0x1 pattern:$0x73625140] %v1404_v4  ;;  %v1434_v11 = vrot.slane %v1406_v49, %v5487_v19  ;;  %v1436_v35 = vcombine.high %v1420_v16, %v1420_v16  ;;  %v1437_v37 = vcombine.high %v1427_v23, %v1427_v23  ;;  %1449 = vst [vmem:[%s6580_s4 + $0x13] sm:$0x1] %v1435_v28  ;;  %4811 = vmatprep.subr.bf16.mxu0 %v5133_v0 }
 0x452   :  { %3056 = vst.sshfl [vmem:[%s6580_s4 + $0x2b] sm:$0x1 pattern:$0x73625140] %v1406_v49  ;;  %4834 = vmatpush3.bf16.msra.mxu1 %v5693_v40 }
 0x453   :  { %4835 = vmatprep.subr.bf16.mxu1 %v5133_v0  ;;  %v1438_v44 = vcombine.high %v1434_v11, %v1434_v11  ;;  %1450 = vst [vmem:[%s6580_s4 + $0x1b] sm:$0x1] %v1437_v37  ;;  %1453 = vst [vmem:[%s6580_s4 + $0x33] sm:$0x1] %v1436_v35  ;;  %v3144_v37 = vld [vmem:[%s6576_s2 + $0x90] sm:$0xff] }
 0x454   :  { %4813 = vmatpush3.bf16.msra.mxu0 %v5885_v24 }
 0x455   :  { %1454 = vst [vmem:[%s6580_s4 + $0x3b] sm:$0x1] %v1438_v44  ;;  %4814 = vmatprep.subr.bf16.mxu0 %v5133_v0  ;;  %v3145_v44 = vld [vmem:[%s6576_s2 + $0x98] sm:$0xff] }
 0x456   :  { %4837 = vmatpush3.bf16.msra.mxu1 %v5707_v13 }
 0x457   :  { %4838 = vmatprep.subr.bf16.mxu1 %v5133_v0 }
 0x458   :  { %4816 = vmatpush3.bf16.msra.mxu0 %v5910_v36 }
 0x459   :  { %4817 = vmatprep.subr.bf16.mxu0 %v5133_v0 }
 0x45a   :  { %4840 = vmatpush3.bf16.msra.mxu1 %v5729_v29 }
 0x45b   :  { %4841 = vmatprep.subr.bf16.mxu1 %v5133_v0 }
 0x45c   :  { %4819 = vmatpush3.bf16.msra.mxu0 %v5925_v5 }
 0x45d   :  { %4820 = vmatprep.subr.bf16.mxu0 %v5133_v0 }
 0x45e   :  { %4843 = vmatpush3.bf16.msra.mxu1 %v5749_v50  ;;  %v3058_v50 = vld [vmem:[%s6578_s0 + $0x68] sm:$0xff] }
 0x45f   :  { %4844 = vmatprep.subr.bf16.mxu1 %v5133_v0 }
 0x460   :  { %4822 = vmatpush3.bf16.msra.mxu0 %v5937_v25 }
 0x461   :  { %4823 = vmatprep.subr.bf16.mxu0 %v5133_v0 }
 0x462   :  { %4846 = vmatpush3.bf16.msra.mxu1 %v5769_v48 }
 0x463   :  { %4847 = vmatprep.subr.bf16.mxu1 %v5133_v0 }
 0x464   :  { %4825 = vmatpush3.bf16.msra.mxu0 %v5949_v42 }
 0x465   :  { %4826 = vmatprep.subr.bf16.mxu0 %v5133_v0 }
 0x466   :  { %4849 = vmatpush3.bf16.msra.mxu1 %v5789_v56 }
 0x467   :  { %4850 = vmatprep.subr.bf16.mxu1 %v5133_v0 }
 0x468   :  { %4828 = vmatpush3.bf16.msra.mxu0 %v5961_v17 }
 0x469   :  { %4853 = vmatprep.subr.bf16.mxu0 %v5133_v0 }
 0x46a   :  { %4852 = vmatpush3.bf16.msra.mxu1 %v5809_v3 }
 0x46b   :  { %4877 = vmatprep.subr.bf16.mxu1 %v5133_v0  ;;  %4152 = vmatmul.mubr.f32.vlgmr.msra.gmra.mrb[14].mxu0 %v6001_v47 }
 0x46c   :  { %4855 = vmatpush3.bf16.msra.mxu0 %v5684_v38  ;;  %4221 = vmatprep.mubr.msk.f32.mxu0 %vm5134_vm0, %v5135_v6  ;;  %v3057_v38 = vld [vmem:[%s6578_s0 + $0x60] sm:$0xff] }
 0x46d   :  { %4856 = vmatprep.subr.bf16.mxu0 %v5133_v0 }
 0x470   :  { %4858 = vmatpush3.bf16.msra.mxu0 %v5697_v41 }
 0x471   :  { %4859 = vmatprep.subr.bf16.mxu0 %v5133_v0 }
 0x474   :  { %4861 = vmatpush3.bf16.msra.mxu0 %v5719_v22 }
 0x475   :  { %4862 = vmatprep.subr.bf16.mxu0 %v5133_v0 }
 0x478   :  { %4864 = vmatpush3.bf16.msra.mxu0 %v5738_v43 }
 0x479   :  { %4865 = vmatprep.subr.bf16.mxu0 %v5133_v0 }
 0x47c   :  { %4867 = vmatpush3.bf16.msra.mxu0 %v5758_v57 }
 0x47d   :  { %4868 = vmatprep.subr.bf16.mxu0 %v5133_v0 }
 0x480   :  { %4870 = vmatpush3.bf16.msra.mxu0 %v5778_v53 }
 0x481   :  { %4871 = vmatprep.subr.bf16.mxu0 %v5133_v0 }
 0x484   :  { %4873 = vmatpush3.bf16.msra.mxu0 %v5798_v62 }
 0x485   :  { %4874 = vmatprep.subr.bf16.mxu0 %v5133_v0 }
 0x488   :  { %4876 = vmatpush3.bf16.msra.mxu0 %v5818_v14 }
 0x489   :  { %4901 = vmatprep.subr.bf16.mxu0 %v5133_v0 }
 0x51e   :  { %v1541_v40 = vpop.f32.mrb[12].mxu0  ;;  %v1627_v41 = vpop.f32.mrb[12].mxu1 }
 0x51f   :  { %v1717_v13 = vadd.f32 %v3057_v38, %v1541_v40  ;;  %v4083_v22 = vpop.f32.mrb[13].mxu0  ;;  %v4118_v29 = vpop.f32.mrb[13].mxu1  ;;  %v1724_v34 = vadd.f32 %v3058_v50, %v1627_v41  ;;  %v6197_v40 = vpack.c.bf16 %v3145_v44, %v3144_v37  ;;  %v2177_v41 = vld [vmem:[%s6576_s2 + $0x20] sm:$0xff] }
 0x520   :  { %v3146_v29 = vld [vmem:[%s6576_s2 + $0xa0] sm:$0xff] }
 0x521   :  { %v3092_v43 = vmul.f32 -1.442695, %v1717_v13  ;;  %v3093_v51 = vmul.f32 -1.442695, %v1724_v34  ;;  %v2178_v13 = vld [vmem:[%s6576_s2 + $0x28] sm:$0xff]  ;;  %v2179_v34 = vld [vmem:[%s6576_s2 + $0x30] sm:$0xff] }
 0x522   :  { %v6207_v22 = vpack.c.bf16 %v2178_v13, %v2177_v41  ;;  %v3162_v41 = vld [vmem:[%s6576_s2 + $0x120] sm:$0xff]  ;;  %v3163_v13 = vld [vmem:[%s6576_s2 + $0x128] sm:$0xff] }
 0x523   :  { %5092 = vpow2.f32 %v3092_v43  ;;  %v3147_v43 = vld [vmem:[%s6576_s2 + $0xa8] sm:$0xff] }
 0x524   :  { %5094 = vpow2.f32 %v3093_v51  ;;  %v6219_v50 = vpack.c.bf16 %v3147_v43, %v3146_v29  ;;  %v2180_v51 = vld [vmem:[%s6576_s2 + $0x38] sm:$0xff] }
 0x52d   :  { %v5093_v45 = vpop.eup %5092 }
 0x52e   :  { %v1721_v46 = vadd.f32 1.0, %v5093_v45  ;;  %v5095_v52 = vpop.eup %5094  ;;  %v6229_v45 = vpack.c.bf16 %v2180_v51, %v2179_v34 }
 0x52f   :  { %v1728_v54 = vadd.f32 1.0, %v5095_v52  ;;  %v3149_v52 = vld [vmem:[%s6576_s2 + $0xb8] sm:$0xff] }
 0x530   :  { %5096 = vrcp.f32 %v1721_v46  ;;  %v3148_v46 = vld [vmem:[%s6576_s2 + $0xb0] sm:$0xff] }
 0x531   :  { %5098 = vrcp.f32 %v1728_v54  ;;  %v6238_v54 = vpack.c.bf16 %v3149_v52, %v3148_v46 }
 0x53a   :  { %v5097_v2 = vpop.eup %5096 }
 0x53b   :  { %v5099_v21 = vpop.eup %5098 }
 0x53c   :  { %v1734_v26 = vsub.f32 1.0, %v5099_v21  ;;  %v1736_v30 = vmul.f32 %v5099_v21, %v6001_v47 }
 0x53e   :  { %v1713_v55 = vpop.f32.mrb[14].mxu0 }
 0x53f   :  { %v1714_v63 = vadd.f32 %v6099_v60, %v1713_v55  ;;  %v4153_v9 = vpop.f32.mrb[15].mxu0  ;;  %v2181_v55 = vld [vmem:[%s6576_s2 + $0x40] sm:$0xff] }
 0x541   :  { %v1731_v12 = vmul.f32 %v5097_v2, %v1714_v63  ;;  %v2182_v63 = vld [vmem:[%s6576_s2 + $0x48] sm:$0xff] }
 0x542   :  { %v6249_v9 = vpack.c.bf16 %v2182_v63, %v2181_v55  ;;  %v3164_v63 = vld [vmem:[%s6576_s2 + $0x130] sm:$0xff] }
 0x543   :  { %v1732_v18 = vadd.f32 %v3059_v10, %v1731_v12 }
 0x545   :  { %5100 = vtanh.f32 %v1732_v18 }
 0x54f   :  { %v5101_v58 = vpop.eup %5100 }
 0x550   :  { %v1735_v27 = vmul.f32 %v5101_v58, %v1734_v26 }
 0x552   :  { %v1737_v32 = vadd.f32 %v1736_v30, %v1735_v27 }
 0x554   :  { %v6107_v33 = vsel %vm1743_vm13, %v1737_v32, %v6001_v47  ;;  %v1745_v61 = vsel %vm1743_vm13, %v1737_v32, 0.0 }
 0x555   :  { %v1747_v1 = vcombine.high %v1745_v61, %v1745_v61  ;;  %v1754_v15 = vrot.slane %v1745_v61, %v5487_v19  ;;  %4187 = vmatmul.mubr.f32.vlgmr.msra.gmra.mrb[14].mxu1 %v6107_v33  ;;  %4222 = vmatmul.mubr.f32.vlgmr.msra.gmra.mrb[16].mxu0 %v6107_v33  ;;  %v3100_v61 = vld [vmem:[%s6578_s0 + $0x88] sm:$0xff] }
 0x556   :  { %4879 = vmatpush3.bf16.msra.mxu1 %v5841_v7  ;;  %4256 = vmatprep.mubr.msk.f32.mxu1 %vm5134_vm0, %v5135_v6 }
 0x557   :  { %v1761_v20 = vrot.slane %v1747_v1, %v5487_v19  ;;  %v1762_v4 = vcombine.high %v1754_v15, %v1754_v15  ;;  %v1770_v39 = vrot.slane %v1754_v15, %v5487_v19  ;;  %3094 = vst.sshfl [vmem:[%s6580_s4 + $0x4] sm:$0x1 pattern:$0x73625140] %v1754_v15  ;;  %4880 = vmatprep.subr.bf16.mxu1 %v5133_v0 }
 0x558   :  { %4291 = vmatprep.mubr.msk.f32.mxu0 %vm5134_vm0, %v5135_v6 }
 0x559   :  { %v1763_v47 = vcombine.high %v1761_v20, %v1761_v20  ;;  %v1777_v7 = vrot.slane %v1761_v20, %v5487_v19  ;;  %v1784_v8 = vrot.slane %v1762_v4, %v5487_v19  ;;  %v1792_v49 = vcombine.high %v1770_v39, %v1770_v39  ;;  %3095 = vst.sshfl [vmem:[%s6580_s4 + $0xc] sm:$0x1 pattern:$0x73625140] %v1762_v4 }
 0x55a   :  { %3096 = vst.sshfl [vmem:[%s6580_s4 + $0x24] sm:$0x1 pattern:$0x73625140] %v1761_v20  ;;  %4882 = vmatpush3.bf16.msra.mxu1 %v5856_v59  ;;  %v2173_v59 = vld [vmem:[%s6576_s2] sm:$0xff] }
 0x55b   :  { %v1791_v16 = vrot.slane %v1763_v47, %v5487_v19  ;;  %v1793_v23 = vcombine.high %v1777_v7, %v1777_v7  ;;  %v1794_v28 = vcombine.high %v1784_v8, %v1784_v8  ;;  %1806 = vst [vmem:[%s6580_s4 + $0x14] sm:$0x1] %v1792_v49  ;;  %3097 = vst.sshfl [vmem:[%s6580_s4 + $0x2c] sm:$0x1 pattern:$0x73625140] %v1763_v47  ;;  %4883 = vmatprep.subr.bf16.mxu1 %v5133_v0 }
 0x55c   :  { %v3158_v47 = vld [vmem:[%s6576_s2 + $0x100] sm:$0xff]  ;;  %v3159_v7 = vld [vmem:[%s6576_s2 + $0x108] sm:$0xff] }
 0x55d   :  { %v1795_v11 = vcombine.high %v1791_v16, %v1791_v16  ;;  %1807 = vst [vmem:[%s6580_s4 + $0x1c] sm:$0x1] %v1794_v28  ;;  %1810 = vst [vmem:[%s6580_s4 + $0x34] sm:$0x1] %v1793_v23  ;;  %v2099_v16 = vpop.permute.xlu1 %2098  ;;  %v6285_v28 = vpack.c.bf16 %v3159_v7, %v3158_v47  ;;  %v3197_v47 = vld [vmem:[%s6576_s2 + $0xf0] sm:$0xff]  ;;  %v3198_v7 = vld [vmem:[%s6576_s2 + $0xf8] sm:$0xff] }
 0x55e   :  { %4885 = vmatpush3.bf16.msra.mxu1 %v5885_v24  ;;  %v2174_v24 = vld [vmem:[%s6576_s2 + $0x8] sm:$0xff]  ;;  %vm2100_vm14 = vcmp.eq.s32.totalorder %v2099_v16, 1  ;;  %v3139_v16 = vld [vmem:[%s6578_s0 + $0x90] sm:$0xff] }
 0x55f   :  { %1811 = vst [vmem:[%s6580_s4 + $0x3c] sm:$0x1] %v1795_v11  ;;  %4886 = vmatprep.subr.bf16.mxu1 %v5133_v0  ;;  %v3160_v11 = vld [vmem:[%s6576_s2 + $0x110] sm:$0xff] }
 0x562   :  { %4888 = vmatpush3.bf16.msra.mxu1 %v5910_v36  ;;  %v3142_v36 = vld [vmem:[%s6576_s2 + $0x80] sm:$0xff] }
 0x563   :  { %4889 = vmatprep.subr.bf16.mxu1 %v5133_v0 }
 0x566   :  { %4891 = vmatpush3.bf16.msra.mxu1 %v5925_v5  ;;  %v6173_v5 = vpack.c.bf16 %v2174_v24, %v2173_v59  ;;  %v3161_v59 = vld [vmem:[%s6576_s2 + $0x118] sm:$0xff] }
 0x567   :  { %4892 = vmatprep.subr.bf16.mxu1 %v5133_v0 }
 0x568   :  { %4903 = vmatpush3.bf16.msra.mxu0 %v6173_v5 }
 0x569   :  { %4904 = vmatprep.subr.bf16.mxu0 %v5133_v0 }
 0x56a   :  { %4894 = vmatpush3.bf16.msra.mxu1 %v5937_v25  ;;  %v3143_v25 = vld [vmem:[%s6576_s2 + $0x88] sm:$0xff] }
 0x56b   :  { %4895 = vmatprep.subr.bf16.mxu1 %v5133_v0  ;;  %v6184_v35 = vpack.c.bf16 %v3143_v25, %v3142_v36 }
 0x56e   :  { %4897 = vmatpush3.bf16.msra.mxu1 %v5949_v42  ;;  %v2175_v42 = vld [vmem:[%s6576_s2 + $0x10] sm:$0xff] }
 0x56f   :  { %4898 = vmatprep.subr.bf16.mxu1 %v5133_v0 }
 0x572   :  { %4900 = vmatpush3.bf16.msra.mxu1 %v5961_v17  ;;  %v2176_v17 = vld [vmem:[%s6576_s2 + $0x18] sm:$0xff] }
 0x573   :  { %4925 = vmatprep.subr.bf16.mxu1 %v5133_v0  ;;  %v6193_v38 = vpack.c.bf16 %v2176_v17, %v2175_v42  ;;  %v6300_v17 = vpack.c.bf16 %v3161_v59, %v3160_v11 }
 0x575   :  { %4257 = vmatmul.mubr.f32.vlgmr.msra.gmra.mrb[16].mxu1 %v6107_v33  ;;  %4906 = vmatpush3.bf16.msra.mxu0 %v6193_v38 }
 0x576   :  { %4326 = vmatprep.mubr.msk.f32.mxu1 %vm5134_vm0, %v5135_v6  ;;  %4927 = vmatpush3.bf16.msra.mxu1 %v6184_v35 }
 0x577   :  { %4928 = vmatprep.subr.bf16.mxu1 %v5133_v0  ;;  %4907 = vmatprep.subr.bf16.mxu0 %v5133_v0 }
 0x579   :  { %4909 = vmatpush3.bf16.msra.mxu0 %v6207_v22 }
 0x57a   :  { %4930 = vmatpush3.bf16.msra.mxu1 %v6197_v40  ;;  %4910 = vmatprep.subr.bf16.mxu0 %v5133_v0 }
 0x57b   :  { %4931 = vmatprep.subr.bf16.mxu1 %v5133_v0 }
 0x57d   :  { %4912 = vmatpush3.bf16.msra.mxu0 %v6229_v45 }
 0x57e   :  { %4933 = vmatpush3.bf16.msra.mxu1 %v6219_v50  ;;  %4913 = vmatprep.subr.bf16.mxu0 %v5133_v0 }
 0x57f   :  { %4934 = vmatprep.subr.bf16.mxu1 %v5133_v0 }
 0x581   :  { %4915 = vmatpush3.bf16.msra.mxu0 %v6249_v9 }
 0x582   :  { %4936 = vmatpush3.bf16.msra.mxu1 %v6238_v54  ;;  %4916 = vmatprep.subr.bf16.mxu0 %v5133_v0 }
 0x583   :  { %4937 = vmatprep.subr.bf16.mxu1 %v5133_v0 }
 0x585   :  { %4918 = vmatpush3.bf16.msra.mxu0 %v5769_v48 }
 0x586   :  { %4939 = vmatpush3.bf16.msra.mxu1 %v5758_v57  ;;  %4919 = vmatprep.subr.bf16.mxu0 %v5133_v0  ;;  %v3098_v57 = vld [vmem:[%s6578_s0 + $0x78] sm:$0xff] }
 0x587   :  { %4940 = vmatprep.subr.bf16.mxu1 %v5133_v0 }
 0x589   :  { %4921 = vmatpush3.bf16.msra.mxu0 %v5789_v56 }
 0x58a   :  { %4942 = vmatpush3.bf16.msra.mxu1 %v5778_v53  ;;  %4922 = vmatprep.subr.bf16.mxu0 %v5133_v0 }
 0x58b   :  { %4943 = vmatprep.subr.bf16.mxu1 %v5133_v0 }
 0x58d   :  { %4924 = vmatpush3.bf16.msra.mxu0 %v5809_v3  ;;  %v3099_v3 = vld [vmem:[%s6578_s0 + $0x80] sm:$0xff] }
 0x58e   :  { %4945 = vmatpush3.bf16.msra.mxu1 %v5798_v62  ;;  %4949 = vmatprep.subr.bf16.mxu0 %v5133_v0 }
 0x58f   :  { %4946 = vmatprep.subr.bf16.mxu1 %v5133_v0 }
 0x592   :  { %4948 = vmatpush3.bf16.msra.mxu1 %v5818_v14 }
 0x593   :  { %4973 = vmatprep.subr.bf16.mxu1 %v5133_v0 }
 0x628   :  { %v1898_v48 = vpop.f32.mrb[14].mxu1  ;;  %v1984_v53 = vpop.f32.mrb[16].mxu0 }
 0x629   :  { %v2074_v56 = vadd.f32 %v3098_v57, %v1898_v48  ;;  %v4188_v62 = vpop.f32.mrb[15].mxu1  ;;  %v4223_v2 = vpop.f32.mrb[17].mxu0  ;;  %v2081_v14 = vadd.f32 %v3099_v3, %v1984_v53  ;;  %v3165_v57 = vld [vmem:[%s6576_s2 + $0x138] sm:$0xff]  ;;  %v3170_v3 = vld [vmem:[%s6576_s2 + $0x160] sm:$0xff] }
 0x62a   :  { %v6354_v53 = vpack.c.bf16 %v3165_v57, %v3164_v63  ;;  %v3168_v2 = vld [vmem:[%s6576_s2 + $0x150] sm:$0xff] }
 0x62b   :  { %v3133_v10 = vmul.f32 -1.442695, %v2074_v56  ;;  %v3134_v12 = vmul.f32 -1.442695, %v2081_v14  ;;  %v3167_v56 = vld [vmem:[%s6576_s2 + $0x148] sm:$0xff] }
 0x62c   :  { %v3171_v14 = vld [vmem:[%s6576_s2 + $0x168] sm:$0xff] }
 0x62d   :  { %5102 = vpow2.f32 %v3133_v10  ;;  %v3169_v10 = vld [vmem:[%s6576_s2 + $0x158] sm:$0xff] }
 0x62e   :  { %5104 = vpow2.f32 %v3134_v12  ;;  %v3172_v12 = vld [vmem:[%s6576_s2 + $0x170] sm:$0xff] }
 0x637   :  { %v5103_v18 = vpop.eup %5102 }
 0x638   :  { %v2078_v21 = vadd.f32 1.0, %v5103_v18  ;;  %v5105_v26 = vpop.eup %5104  ;;  %v3173_v18 = vld [vmem:[%s6576_s2 + $0x178] sm:$0xff] }
 0x639   :  { %v2085_v58 = vadd.f32 1.0, %v5105_v26 }
 0x63a   :  { %5106 = vrcp.f32 %v2078_v21  ;;  %v6403_v21 = vpack.c.bf16 %v3173_v18, %v3172_v12 }
 0x63b   :  { %5108 = vrcp.f32 %v2085_v58 }
 0x644   :  { %v5107_v32 = vpop.eup %5106 }
 0x645   :  { %v5109_v20 = vpop.eup %5108 }
 0x646   :  { %v2091_v4 = vsub.f32 1.0, %v5109_v20  ;;  %v2093_v49 = vmul.f32 %v5109_v20, %v6107_v33  ;;  %v2544_v20 = vld [vmem:[%s6576_s2 + $0x70] sm:$0xff] }
 0x648   :  { %v2070_v27 = vpop.f32.mrb[16].mxu1 }
 0x649   :  { %v2071_v30 = vadd.f32 %v6099_v60, %v2070_v27  ;;  %v4258_v31 = vpop.f32.mrb[17].mxu1  ;;  %v3194_v27 = vld [vmem:[%s6576_s2 + $0xd8] sm:$0xff] }
 0x64a   :  { %v2543_v31 = vld [vmem:[%s6576_s2 + $0x68] sm:$0xff] }
 0x64b   :  { %v2088_v1 = vmul.f32 %v5107_v32, %v2071_v30  ;;  %v2542_v30 = vld [vmem:[%s6576_s2 + $0x60] sm:$0xff] }
 0x64d   :  { %v2089_v15 = vadd.f32 %v3100_v61, %v2088_v1  ;;  %v3195_v61 = vld [vmem:[%s6576_s2 + $0xe0] sm:$0xff]  ;;  %v3196_v1 = vld [vmem:[%s6576_s2 + $0xe8] sm:$0xff] }
 0x64f   :  { %5110 = vtanh.f32 %v2089_v15  ;;  %v4992_v15 = vpack.c.bf16 %v2543_v31, %v2542_v30 }
 0x659   :  { %v5111_v39 = vpop.eup %5110 }
 0x65a   :  { %v2092_v8 = vmul.f32 %v5111_v39, %v2091_v4  ;;  %v2545_v4 = vld [vmem:[%s6576_s2 + $0x78] sm:$0xff]  ;;  %v5016_v39 = vpack.c.bf16 %v3196_v1, %v3195_v61 }
 0x65c   :  { %v2094_v23 = vadd.f32 %v2093_v49, %v2092_v8  ;;  %v4995_v8 = vpack.c.bf16 %v2545_v4, %v2544_v20  ;;  %v5019_v49 = vpack.c.bf16 %v3198_v7, %v3197_v47 }
 0x65e   :  { %v6294_v24 = vsel %vm2100_vm14, %v2094_v23, %v6107_v33  ;;  %v2102_v36 = vsel %vm2100_vm14, %v2094_v23, 0.0 }
 0x65f   :  { %v2104_v25 = vcombine.high %v2102_v36, %v2102_v36  ;;  %v2111_v42 = vrot.slane %v2102_v36, %v5487_v19  ;;  %4292 = vmatmul.mubr.f32.vlgmr.msra.gmra.mrb[18].mxu0 %v6294_v24  ;;  %4327 = vmatmul.mubr.f32.vlgmr.msra.gmra.mrb[18].mxu1 %v6294_v24 }
 0x660   :  { %4951 = vmatpush3.bf16.msra.mxu0 %v6285_v28  ;;  %4361 = vmatprep.mubr.msk.f32.mxu0 %vm5134_vm0, %v5135_v6 }
 0x661   :  { %v2118_v37 = vrot.slane %v2104_v25, %v5487_v19  ;;  %v2119_v44 = vcombine.high %v2111_v42, %v2111_v42  ;;  %v2127_v33 = vrot.slane %v2111_v42, %v5487_v19  ;;  %3135 = vst.sshfl [vmem:[%s6580_s4 + $0x5] sm:$0x1 pattern:$0x73625140] %v2111_v42  ;;  %4952 = vmatprep.subr.bf16.mxu0 %v5133_v0 }
 0x662   :  { %4975 = vmatpush3.bf16.msra.mxu1 %v6173_v5  ;;  %4396 = vmatprep.mubr.msk.f32.mxu1 %vm5134_vm0, %v5135_v6  ;;  %v6329_v5 = vpack.c.bf16 %v3163_v13, %v3162_v41 }
 0x663   :  { %4976 = vmatprep.subr.bf16.mxu1 %v5133_v0  ;;  %v2120_v29 = vcombine.high %v2118_v37, %v2118_v37  ;;  %v2134_v43 = vrot.slane %v2118_v37, %v5487_v19  ;;  %v2141_v34 = vrot.slane %v2119_v44, %v5487_v19  ;;  %v2149_v51 = vcombine.high %v2127_v33, %v2127_v33 }
 0x664   :  { %3136 = vst.sshfl [vmem:[%s6580_s4 + $0xd] sm:$0x1 pattern:$0x73625140] %v2119_v44  ;;  %4954 = vmatpush3.bf16.msra.mxu0 %v6300_v17 }
 0x665   :  { %3137 = vst.sshfl [vmem:[%s6580_s4 + $0x25] sm:$0x1 pattern:$0x73625140] %v2118_v37  ;;  %v2148_v46 = vrot.slane %v2120_v29, %v5487_v19  ;;  %v2150_v52 = vcombine.high %v2134_v43, %v2134_v43  ;;  %v2151_v55 = vcombine.high %v2141_v34, %v2141_v34  ;;  %2163 = vst [vmem:[%s6580_s4 + $0x15] sm:$0x1] %v2149_v51  ;;  %4955 = vmatprep.subr.bf16.mxu0 %v5133_v0 }
 0x666   :  { %3138 = vst.sshfl [vmem:[%s6580_s4 + $0x2d] sm:$0x1 pattern:$0x73625140] %v2120_v29  ;;  %4978 = vmatpush3.bf16.msra.mxu1 %v6193_v38  ;;  %v3166_v38 = vld [vmem:[%s6576_s2 + $0x140] sm:$0xff]  ;;  %v3140_v37 = vld [vmem:[%s6578_s0 + $0x98] sm:$0xff] }
 0x667   :  { %4979 = vmatprep.subr.bf16.mxu1 %v5133_v0  ;;  %v2152_v48 = vcombine.high %v2148_v46, %v2148_v46  ;;  %2164 = vst [vmem:[%s6580_s4 + $0x1d] sm:$0x1] %v2151_v55  ;;  %2167 = vst [vmem:[%s6580_s4 + $0x35] sm:$0x1] %v2150_v52  ;;  %v6369_v62 = vpack.c.bf16 %v3167_v56, %v3166_v38  ;;  %v3141_v55 = vld [vmem:[%s6578_s0 + $0xa0] sm:$0xff] }
 0x668   :  { %4957 = vmatpush3.bf16.msra.mxu0 %v6329_v5 }
 0x669   :  { %2168 = vst [vmem:[%s6580_s4 + $0x3d] sm:$0x1] %v2152_v48  ;;  %4958 = vmatprep.subr.bf16.mxu0 %v5133_v0 }
 0x66a   :  { %4981 = vmatpush3.bf16.msra.mxu1 %v6207_v22  ;;  %v6381_v22 = vpack.c.bf16 %v3169_v10, %v3168_v2  ;;  %v2456_v2 = vpop.permute.xlu0 %2455 }
 0x66b   :  { %4982 = vmatprep.subr.bf16.mxu1 %v5133_v0  ;;  %vm2457_vm15 = vcmp.eq.s32.totalorder %v2456_v2, 1 }
 0x66c   :  { %4960 = vmatpush3.bf16.msra.mxu0 %v6354_v53 }
 0x66d   :  { %4961 = vmatprep.subr.bf16.mxu0 %v5133_v0 }
 0x66e   :  { %4984 = vmatpush3.bf16.msra.mxu1 %v6229_v45  ;;  %v6393_v45 = vpack.c.bf16 %v3171_v14, %v3170_v3 }
 0x66f   :  { %4985 = vmatprep.subr.bf16.mxu1 %v5133_v0 }
 0x670   :  { %4963 = vmatpush3.bf16.msra.mxu0 %v6369_v62 }
 0x671   :  { %4964 = vmatprep.subr.bf16.mxu0 %v5133_v0 }
 0x672   :  { %4987 = vmatpush3.bf16.msra.mxu1 %v6249_v9  ;;  %v3192_v9 = vld [vmem:[%s6576_s2 + $0xc8] sm:$0xff] }
 0x673   :  { %4988 = vmatprep.subr.bf16.mxu1 %v5133_v0 }
 0x674   :  { %4966 = vmatpush3.bf16.msra.mxu0 %v6381_v22 }
 0x675   :  { %4967 = vmatprep.subr.bf16.mxu0 %v5133_v0 }
 0x678   :  { %4969 = vmatpush3.bf16.msra.mxu0 %v6393_v45 }
 0x679   :  { %4970 = vmatprep.subr.bf16.mxu0 %v5133_v0 }
 0x67c   :  { %4972 = vmatpush3.bf16.msra.mxu0 %v6403_v21 }
 0x67d   :  { %4997 = vmatprep.subr.bf16.mxu0 %v5133_v0 }
 0x67f   :  { %4362 = vmatmul.mubr.f32.vlgmr.msra.gmra.mrb[20].mxu0 %v6294_v24 }
 0x680   :  { %4999 = vmatpush3.bf16.msra.mxu0 %v6184_v35  ;;  %4431 = vmatprep.mubr.msk.f32.mxu0 %vm5134_vm0, %v5135_v6  ;;  %v3191_v35 = vld [vmem:[%s6576_s2 + $0xc0] sm:$0xff] }
 0x681   :  { %5000 = vmatprep.subr.bf16.mxu0 %v5133_v0  ;;  %v5010_v26 = vpack.c.bf16 %v3192_v9, %v3191_v35 }
 0x684   :  { %5002 = vmatpush3.bf16.msra.mxu0 %v6197_v40  ;;  %v2540_v40 = vld [vmem:[%s6576_s2 + $0x50] sm:$0xff] }
 0x685   :  { %5003 = vmatprep.subr.bf16.mxu0 %v5133_v0 }
 0x688   :  { %5005 = vmatpush3.bf16.msra.mxu0 %v6219_v50  ;;  %v2541_v50 = vld [vmem:[%s6576_s2 + $0x58] sm:$0xff] }
 0x689   :  { %5006 = vmatprep.subr.bf16.mxu0 %v5133_v0  ;;  %v4989_v58 = vpack.c.bf16 %v2541_v50, %v2540_v40 }
 0x68b   :  { %4990 = vmatpush3.bf16.msra.mxu1 %v4989_v58 }
 0x68c   :  { %5008 = vmatpush3.bf16.msra.mxu0 %v6238_v54  ;;  %v3193_v54 = vld [vmem:[%s6576_s2 + $0xd0] sm:$0xff]  ;;  %4991 = vmatprep.subr.bf16.mxu1 %v5133_v0 }
 0x68d   :  { %5009 = vmatprep.subr.bf16.mxu0 %v5133_v0  ;;  %v5013_v32 = vpack.c.bf16 %v3194_v27, %v3193_v54 }
 0x68f   :  { %4993 = vmatpush3.bf16.msra.mxu1 %v4992_v15 }
 0x690   :  { %5011 = vmatpush3.bf16.msra.mxu0 %v5010_v26  ;;  %4994 = vmatprep.subr.bf16.mxu1 %v5133_v0 }
 0x691   :  { %5012 = vmatprep.subr.bf16.mxu0 %v5133_v0 }
 0x693   :  { %4996 = vmatpush3.bf16.msra.mxu1 %v4995_v8 }
 0x694   :  { %5014 = vmatpush3.bf16.msra.mxu0 %v5013_v32  ;;  %5021 = vmatprep.subr.bf16.mxu1 %v5133_v0 }
 0x695   :  { %5015 = vmatprep.subr.bf16.mxu0 %v5133_v0 }
 0x698   :  { %5017 = vmatpush3.bf16.msra.mxu0 %v5016_v39 }
 0x699   :  { %5018 = vmatprep.subr.bf16.mxu0 %v5133_v0 }
 0x69c   :  { %5020 = vmatpush3.bf16.msra.mxu0 %v5019_v49  ;;  %v3182_v49 = vld [vmem:[%s6578_s0 + $0xb8] sm:$0xff] }
 0x732   :  { %v2255_v23 = vpop.f32.mrb[18].mxu0  ;;  %v2341_v11 = vpop.f32.mrb[18].mxu1 }
 0x733   :  { %v2431_v59 = vadd.f32 %v3139_v16, %v2255_v23  ;;  %v4293_v36 = vpop.f32.mrb[19].mxu0  ;;  %v4328_v25 = vpop.f32.mrb[19].mxu1  ;;  %v2438_v44 = vadd.f32 %v3140_v37, %v2341_v11 }
 0x734   :  { %v2813_v25 = vpop.permute.xlu1 %2812 }
 0x735   :  { %v3174_v42 = vmul.f32 -1.442695, %v2431_v59  ;;  %v3175_v33 = vmul.f32 -1.442695, %v2438_v44 }
 0x737   :  { %5112 = vpow2.f32 %v3174_v42 }
 0x738   :  { %5114 = vpow2.f32 %v3175_v33 }
 0x741   :  { %v5113_v41 = vpop.eup %5112 }
 0x742   :  { %v2435_v13 = vadd.f32 1.0, %v5113_v41  ;;  %v5115_v29 = vpop.eup %5114 }
 0x743   :  { %v2442_v43 = vadd.f32 1.0, %v5115_v29 }
 0x744   :  { %5116 = vrcp.f32 %v2435_v13 }
 0x745   :  { %5118 = vrcp.f32 %v2442_v43 }
 0x74e   :  { %v5117_v52 = vpop.eup %5116 }
 0x74f   :  { %v5119_v48 = vpop.eup %5118 }
 0x750   :  { %v2448_v38 = vsub.f32 1.0, %v5119_v48  ;;  %v2450_v3 = vmul.f32 %v5119_v48, %v6294_v24 }
 0x752   :  { %v2427_v34 = vpop.f32.mrb[20].mxu0 }
 0x753   :  { %v2428_v51 = vadd.f32 %v6099_v60, %v2427_v34  ;;  %v4363_v46 = vpop.f32.mrb[21].mxu0 }
 0x755   :  { %v2445_v63 = vmul.f32 %v5117_v52, %v2428_v51 }
 0x757   :  { %v2446_v57 = vadd.f32 %v3141_v55, %v2445_v63 }
 0x759   :  { %5120 = vtanh.f32 %v2446_v57 }
 0x763   :  { %v5121_v56 = vpop.eup %5120 }
 0x764   :  { %v2449_v10 = vmul.f32 %v5121_v56, %v2448_v38 }
 0x766   :  { %v2451_v14 = vadd.f32 %v2450_v3, %v2449_v10 }
 0x768   :  { %v6479_v12 = vsel %vm2457_vm15, %v2451_v14, %v6294_v24  ;;  %v2459_v18 = vsel %vm2457_vm15, %v2451_v14, 0.0 }
 0x769   :  { %v2461_v35 = vcombine.high %v2459_v18, %v2459_v18  ;;  %v2468_v9 = vrot.slane %v2459_v18, %v5487_v19  ;;  %4397 = vmatmul.mubr.f32.vlgmr.msra.gmra.mrb[20].mxu1 %v6479_v12  ;;  %4432 = vmatmul.mubr.f32.vlgmr.msra.gmra.mrb[22].mxu0 %v6479_v12 }
 0x76a   :  { %5023 = vmatpush3.bf16.msra.mxu1 %v6285_v28  ;;  %4466 = vmatprep.mubr.msk.f32.mxu1 %vm5134_vm0, %v5135_v6  ;;  %vm2814_vm0 = vcmp.eq.s32.totalorder %v2813_v25, 1 }
 0x76b   :  { %v2475_v26 = vrot.slane %v2461_v35, %v5487_v19  ;;  %v2476_v40 = vcombine.high %v2468_v9, %v2468_v9  ;;  %v2484_v50 = vrot.slane %v2468_v9, %v5487_v19  ;;  %3176 = vst.sshfl [vmem:[%s6580_s4 + $0x6] sm:$0x1 pattern:$0x73625140] %v2468_v9  ;;  %5024 = vmatprep.subr.bf16.mxu1 %v5133_v0 }
 0x76d   :  { %v2477_v24 = vcombine.high %v2475_v26, %v2475_v26  ;;  %v2491_v54 = vrot.slane %v2475_v26, %v5487_v19  ;;  %v2498_v58 = vrot.slane %v2476_v40, %v5487_v19  ;;  %v2506_v28 = vcombine.high %v2484_v50, %v2484_v50  ;;  %3177 = vst.sshfl [vmem:[%s6580_s4 + $0xe] sm:$0x1 pattern:$0x73625140] %v2476_v40 }
 0x76e   :  { %3178 = vst.sshfl [vmem:[%s6580_s4 + $0x26] sm:$0x1 pattern:$0x73625140] %v2475_v26  ;;  %5026 = vmatpush3.bf16.msra.mxu1 %v6300_v17  ;;  %v3180_v17 = vld [vmem:[%s6578_s0 + $0xa8] sm:$0xff] }
 0x76f   :  { %v2505_v6 = vrot.slane %v2477_v24, %v5487_v19  ;;  %v2507_v27 = vcombine.high %v2491_v54, %v2491_v54  ;;  %v2508_v30 = vcombine.high %v2498_v58, %v2498_v58  ;;  %2520 = vst [vmem:[%s6580_s4 + $0x16] sm:$0x1] %v2506_v28  ;;  %3179 = vst.sshfl [vmem:[%s6580_s4 + $0x2e] sm:$0x1 pattern:$0x73625140] %v2477_v24  ;;  %5027 = vmatprep.subr.bf16.mxu1 %v5133_v0 }
 0x771   :  { %v2509_v31 = vcombine.high %v2505_v6, %v2505_v6  ;;  %2521 = vst [vmem:[%s6580_s4 + $0x1e] sm:$0x1] %v2508_v30  ;;  %2524 = vst [vmem:[%s6580_s4 + $0x36] sm:$0x1] %v2507_v27 }
 0x772   :  { %5029 = vmatpush3.bf16.msra.mxu1 %v6329_v5 }
 0x773   :  { %2525 = vst [vmem:[%s6580_s4 + $0x3e] sm:$0x1] %v2509_v31  ;;  %5030 = vmatprep.subr.bf16.mxu1 %v5133_v0 }
 0x776   :  { %5032 = vmatpush3.bf16.msra.mxu1 %v6354_v53 }
 0x777   :  { %5033 = vmatprep.subr.bf16.mxu1 %v5133_v0 }
 0x77a   :  { %5035 = vmatpush3.bf16.msra.mxu1 %v6369_v62 }
 0x77b   :  { %5036 = vmatprep.subr.bf16.mxu1 %v5133_v0 }
 0x77e   :  { %5038 = vmatpush3.bf16.msra.mxu1 %v6381_v22 }
 0x77f   :  { %5039 = vmatprep.subr.bf16.mxu1 %v5133_v0 }
 0x782   :  { %5041 = vmatpush3.bf16.msra.mxu1 %v6393_v45  ;;  %v3181_v45 = vld [vmem:[%s6578_s0 + $0xb0] sm:$0xff] }
 0x783   :  { %5042 = vmatprep.subr.bf16.mxu1 %v5133_v0 }
 0x786   :  { %5044 = vmatpush3.bf16.msra.mxu1 %v6403_v21 }
 0x789   :  { %4467 = vmatmul.mubr.f32.vlgmr.msra.gmra.mrb[22].mxu1 %v6479_v12 }
 0x83c   :  { %v2612_v5 = vpop.f32.mrb[20].mxu1  ;;  %v2698_v53 = vpop.f32.mrb[22].mxu0 }
 0x83d   :  { %v2788_v62 = vadd.f32 %v3180_v17, %v2612_v5  ;;  %v4398_v32 = vpop.f32.mrb[21].mxu1  ;;  %v4433_v61 = vpop.f32.mrb[23].mxu0  ;;  %v2795_v0 = vadd.f32 %v3181_v45, %v2698_v53 }
 0x83f   :  { %v3215_v22 = vmul.f32 -1.442695, %v2788_v62  ;;  %v3216_v1 = vmul.f32 -1.442695, %v2795_v0 }
 0x841   :  { %5122 = vpow2.f32 %v3215_v22 }
 0x842   :  { %5124 = vpow2.f32 %v3216_v1 }
 0x84b   :  { %v5123_v21 = vpop.eup %5122 }
 0x84c   :  { %v2792_v15 = vadd.f32 1.0, %v5123_v21  ;;  %v5125_v20 = vpop.eup %5124 }
 0x84d   :  { %v2799_v4 = vadd.f32 1.0, %v5125_v20 }
 0x84e   :  { %5126 = vrcp.f32 %v2792_v15 }
 0x84f   :  { %5128 = vrcp.f32 %v2799_v4 }
 0x858   :  { %v5127_v8 = vpop.eup %5126 }
 0x859   :  { %v5129_v11 = vpop.eup %5128 }
 0x85a   :  { %v2805_v59 = vsub.f32 1.0, %v5129_v11  ;;  %v2807_v42 = vmul.f32 %v5129_v11, %v6479_v12 }
 0x85c   :  { %v2784_v39 = vpop.f32.mrb[22].mxu1 }
 0x85d   :  { %v2785_v47 = vadd.f32 %v6099_v60, %v2784_v39  ;;  %v4468_v7 = vpop.f32.mrb[23].mxu1 }
 0x85f   :  { %v2802_v16 = vmul.f32 %v5127_v8, %v2785_v47 }
 0x861   :  { %v2803_v23 = vadd.f32 %v3182_v49, %v2802_v16 }
 0x863   :  { %5130 = vtanh.f32 %v2803_v23 }
 0x86d   :  { %v5131_v36 = vpop.eup %5130 }
 0x86e   :  { %v2806_v37 = vmul.f32 %v5131_v36, %v2805_v59 }
 0x870   :  { %v2808_v44 = vadd.f32 %v2807_v42, %v2806_v37 }
 0x872   :  { %v2815_v60 = vsel %vm2814_vm0, %v2808_v44, %v6479_v12  ;;  %v2816_v33 = vsel %vm2814_vm0, %v2808_v44, 0.0 }
 0x873   :  { %v2818_v41 = vcombine.high %v2816_v33, %v2816_v33  ;;  %v2825_v13 = vrot.slane %v2816_v33, %v5487_v19  ;;  %2883 = vst [vmem:[%s6581_s5] sm:$0xff] %v2815_v60 }
 0x875   :  { %v2832_v29 = vrot.slane %v2818_v41, %v5487_v19  ;;  %v2833_v43 = vcombine.high %v2825_v13, %v2825_v13  ;;  %v2841_v34 = vrot.slane %v2825_v13, %v5487_v19  ;;  %3217 = vst.sshfl [vmem:[%s6580_s4 + $0x7] sm:$0x1 pattern:$0x73625140] %v2825_v13 }
 0x877   :  { %v2834_v51 = vcombine.high %v2832_v29, %v2832_v29  ;;  %v2848_v46 = vrot.slane %v2832_v29, %v5487_v19  ;;  %v2855_v52 = vrot.slane %v2833_v43, %v5487_v19  ;;  %v2863_v55 = vcombine.high %v2841_v34, %v2841_v34  ;;  %3218 = vst.sshfl [vmem:[%s6580_s4 + $0xf] sm:$0x1 pattern:$0x73625140] %v2833_v43 }
 0x878   :  { %3219 = vst.sshfl [vmem:[%s6580_s4 + $0x27] sm:$0x1 pattern:$0x73625140] %v2832_v29 }
 0x879   :  { %v2862_v63 = vrot.slane %v2834_v51, %v5487_v19  ;;  %v2864_v57 = vcombine.high %v2848_v46, %v2848_v46  ;;  %v2865_v48 = vcombine.high %v2855_v52, %v2855_v52  ;;  %2877 = vst [vmem:[%s6580_s4 + $0x17] sm:$0x1] %v2863_v55  ;;  %3220 = vst.sshfl [vmem:[%s6580_s4 + $0x2f] sm:$0x1 pattern:$0x73625140] %v2834_v51 }
 0x87b   :  { %v2866_v38 = vcombine.high %v2862_v63, %v2862_v63  ;;  %2878 = vst [vmem:[%s6580_s4 + $0x1f] sm:$0x1] %v2865_v48  ;;  %2881 = vst [vmem:[%s6580_s4 + $0x37] sm:$0x1] %v2864_v57 }
 0x87d   :  { %2882 = vst [vmem:[%s6580_s4 + $0x3f] sm:$0x1] %v2866_v38 }

</bundles_post_ra>
